<compile_context>
chip_gen: v5e
topology: v5e:2x2
jax: 0.10.0
libtpu: 0.0.40
codegen_flags: <defaults>
</compile_context>

<pallas_src>
import math

import jax
import jax.numpy as jnp
from jax import lax
from jax.experimental import pallas as pl
from jax.experimental.pallas import tpu as pltpu


# ----------------------------------------------------------------------------
# Tile fitting helper (guards the "tile collapses to full dim" hazard)
# ----------------------------------------------------------------------------
def _fit_tile(dim, target, align=128):
    """Largest tile <= target that divides `dim`, preferring multiples of
    `align`.  Only returns `dim` itself when dim <= target (or, pathologically,
    when no divisor exists at all)."""
    if dim <= target:
        return dim
    t = (target // align) * align
    while t >= align:
        if dim % t == 0:
            return t
        t -= align
    for t in range(target, 0, -1):
        if dim % t == 0:
            return t
    return dim


# ----------------------------------------------------------------------------
# Tiled matmul kernel (bf16 inputs, fp32 accumulation)
# ----------------------------------------------------------------------------
def _matmul_kernel(x_ref, w_ref, o_ref, acc_ref):
    @pl.when(pl.program_id(2) == 0)
    def _init():
        acc_ref[...] = jnp.zeros_like(acc_ref)

    acc_ref[...] += jnp.dot(x_ref[...], w_ref[...],
                            preferred_element_type=jnp.float32)

    @pl.when(pl.program_id(2) == pl.num_programs(2) - 1)
    def _store():
        o_ref[...] = acc_ref[...].astype(o_ref.dtype)


def matmul(x, w, out_dtype, *, tm=512, tn=512, tk=1024):
    """x: (M, K), w: (K, N) -> (M, N) tiled/pipelined Pallas matmul."""
    M, K = x.shape
    K2, N = w.shape
    assert K == K2
    tm = _fit_tile(M, tm)
    tn = _fit_tile(N, tn)
    tk = _fit_tile(K, tk)
    return pl.pallas_call(
        _matmul_kernel,
        out_shape=jax.ShapeDtypeStruct((M, N), out_dtype),
        grid=(M // tm, N // tn, K // tk),
        in_specs=[
            pl.BlockSpec((tm, tk), lambda i, j, k: (i, k)),
            pl.BlockSpec((tk, tn), lambda i, j, k: (k, j)),
        ],
        out_specs=pl.BlockSpec((tm, tn), lambda i, j, k: (i, j)),
        scratch_shapes=[pltpu.VMEM((tm, tn), jnp.float32)],
        compiler_params=pltpu.CompilerParams(
            dimension_semantics=("parallel", "parallel", "arbitrary")),
    )(x, w)


# ----------------------------------------------------------------------------
# RoPE tables (host-side precompute; rotation happens in the pre-pass kernel)
# ----------------------------------------------------------------------------
def rope_cos_sin_ref(S, D, base):
    inv_freq = 1.0 / (base ** (jnp.arange(0, D, 2, dtype=jnp.float32) / D))
    t = jnp.arange(S, dtype=jnp.float32)
    freqs = jnp.outer(t, inv_freq)
    emb = jnp.concatenate([freqs, freqs], axis=-1)  # (S, D)
    return jnp.cos(emb), jnp.sin(emb)


def rope_tables(S, D, base):
    cos, sin = rope_cos_sin_ref(S, D, base)
    sign = jnp.concatenate([-jnp.ones((D // 2,), jnp.float32),
                            jnp.ones((D // 2,), jnp.float32)])
    # rotate_half(x) == roll(x, D/2) * sign; fold the sign into sin once.
    return cos, sin * sign[None, :]


# ----------------------------------------------------------------------------
# Pre-pass: apply RoPE to Q and K once, fold 1/sqrt(D) into Q, and relayout
# the fused QKV activation into head-major (B, heads, S, D) bf16 tensors so
# the attention inner loop only does contiguous DMAs with zero elementwise
# RoPE work.
# ----------------------------------------------------------------------------
def rope_split(qkv, cos, sin_signed, *, B, S, NH, NKV, D, scale, ts=256):
    group = NH // NKV
    ts = _fit_tile(S, ts)

    def kernel(qf_ref, kf_ref, vf_ref, cos_ref, sin_ref, q_out, k_out, v_out):
        cos_t = cos_ref[...]
        sin_t = sin_ref[...]
        # K head for this (b, kv-head, seq-tile): rotate once, store bf16.
        k = kf_ref[0].astype(jnp.float32)
        k = k * cos_t + pltpu.roll(k, shift=D // 2, axis=1) * sin_t
        k_out[0, 0] = k.astype(k_out.dtype)
        # V head: pure relayout into head-major.
        v_out[0, 0] = vf_ref[0]
        # The `group` query heads sharing this kv head.
        for g in range(group):
            q = qf_ref[0, :, g * D:(g + 1) * D].astype(jnp.float32)
            q = q * cos_t + pltpu.roll(q, shift=D // 2, axis=1) * sin_t
            q_out[0, g] = (q * scale).astype(q_out.dtype)

    # Heads are carved out of the fused QKV activation via block indices along
    # the last (lane) axis: q heads [h*group, (h+1)*group), k head NH+h,
    # v head NH+NKV+h.
    q_in_spec = pl.BlockSpec((1, ts, group * D), lambda b, h, si: (b, si, h))
    k_in_spec = pl.BlockSpec((1, ts, D), lambda b, h, si: (b, si, NH + h))
    v_in_spec = pl.BlockSpec((1, ts, D), lambda b, h, si: (b, si, NH + NKV + h))
    cs_spec = pl.BlockSpec((ts, D), lambda b, h, si: (si, 0))
    q_out_spec = pl.BlockSpec((1, group, ts, D), lambda b, h, si: (b, h, si, 0))
    kv_out_spec = pl.BlockSpec((1, 1, ts, D), lambda b, h, si: (b, h, si, 0))

    return pl.pallas_call(
        kernel,
        out_shape=(jax.ShapeDtypeStruct((B, NH, S, D), jnp.bfloat16),
                   jax.ShapeDtypeStruct((B, NKV, S, D), jnp.bfloat16),
                   jax.ShapeDtypeStruct((B, NKV, S, D), jnp.bfloat16)),
        grid=(B, NKV, S // ts),
        in_specs=[q_in_spec, k_in_spec, v_in_spec, cs_spec, cs_spec],
        out_specs=(q_out_spec, kv_out_spec, kv_out_spec),
        compiler_params=pltpu.CompilerParams(
            dimension_semantics=("parallel", "parallel", "parallel")),
    )(qkv, qkv, qkv, cos, sin_signed)


# ----------------------------------------------------------------------------
# Flash-style causal attention, GQA-group batched, causal-clamped K/V DMA
# ----------------------------------------------------------------------------
def flash_attention(q, k, v, *, B, S, NH, NKV, D, tq=256, tkv=256):
    """q: (B, NH, S, D) bf16 (RoPE'd, pre-scaled), k: (B, NKV, S, D) bf16
    (RoPE'd), v: (B, NKV, S, D) bf16.  Returns (B, S, NH*D) bf16."""
    group = NH // NKV
    # v6e/v7x: tq=tkv=256 fills the 2x256^2 MXU; v5e: tkv=128 already fills
    # its 4x128^2 MXU (raise only tq there).
    tq = _fit_tile(S, tq)
    tkv = _fit_tile(S, tkv)

    def kernel(q_ref, k_ref, v_ref, o_ref, m_sc, l_sc, acc_sc):
        qi = pl.program_id(2)
        ki = pl.program_id(3)

        @pl.when(ki == 0)
        def _init():
            m_sc[...] = jnp.full_like(m_sc, -jnp.inf)
            l_sc[...] = jnp.zeros_like(l_sc)
            acc_sc[...] = jnp.zeros_like(acc_sc)

        # Compute only for kv blocks at / below the causal diagonal.  Blocks
        # above the diagonal were not even DMA'd (index_map clamp below).
        @pl.when(ki * tkv < (qi + 1) * tq)
        def _compute():
            k_t = k_ref[0, 0]                      # (tkv, D) bf16, pre-RoPE'd
            v_t = v_ref[0, 0]                      # (tkv, D) bf16
            # Causal mask computed once per kv block, reused for every q head
            # in the GQA group.
            row = qi * tq + lax.broadcasted_iota(jnp.int32, (tq, tkv), 0)
            col = ki * tkv + lax.broadcasted_iota(jnp.int32, (tq, tkv), 1)
            causal = col <= row
            for g in range(group):
                q_t = q_ref[0, g]                  # (tq, D) bf16, scaled
                s = lax.dot_general(q_t, k_t, (((1,), (1,)), ((), ())),
                                    preferred_element_type=jnp.float32)
                s = jnp.where(causal, s, -1e30)
                m_prev = m_sc[g]
                m_new = jnp.maximum(m_prev, jnp.max(s, axis=-1, keepdims=True))
                alpha = jnp.exp(m_prev - m_new)
                p = jnp.exp(s - m_new)
                l_sc[g] = alpha * l_sc[g] + jnp.sum(p, axis=-1, keepdims=True)
                acc_sc[g] = alpha * acc_sc[g] + jnp.dot(
                    p.astype(jnp.bfloat16), v_t,
                    preferred_element_type=jnp.float32)
                m_sc[g] = m_new

        @pl.when(ki == pl.num_programs(3) - 1)
        def _finalize():
            outs = []
            for g in range(group):
                outs.append((acc_sc[g] *
                             pl.reciprocal(l_sc[g], approx=True))
                            .astype(o_ref.dtype))
            # One lane-dense (tq, group*D) store.
            o_ref[0] = jnp.concatenate(outs, axis=-1)

    def _kv_clamp(qi, ki):
        # Last kv block that intersects the causal region of this q tile.
        # Above-diagonal steps reuse the previous block index -> DMA skipped.
        return jnp.minimum(ki, ((qi + 1) * tq - 1) // tkv)

    q_spec = pl.BlockSpec((1, group, tq, D),
                          lambda b, h, qi, ki: (b, h, qi, 0))
    k_spec = pl.BlockSpec((1, 1, tkv, D),
                          lambda b, h, qi, ki: (b, h, _kv_clamp(qi, ki), 0))
    v_spec = pl.BlockSpec((1, 1, tkv, D),
                          lambda b, h, qi, ki: (b, h, _kv_clamp(qi, ki), 0))
    # Output written directly in (B, S, NH*D) layout (no transpose afterwards);
    # block index h along the lane axis covers the `group` heads of this step.
    o_spec = pl.BlockSpec((1, tq, group * D),
                          lambda b, h, qi, ki: (b, qi, h))

    return pl.pallas_call(
        kernel,
        out_shape=jax.ShapeDtypeStruct((B, S, NH * D), jnp.bfloat16),
        grid=(B, NKV, S // tq, S // tkv),
        in_specs=[q_spec, k_spec, v_spec],
        out_specs=o_spec,
        scratch_shapes=[pltpu.VMEM((group, tq, 1), jnp.float32),
                        pltpu.VMEM((group, tq, 1), jnp.float32),
                        pltpu.VMEM((group, tq, D), jnp.float32)],
        compiler_params=pltpu.CompilerParams(
            dimension_semantics=("parallel", "parallel", "parallel",
                                 "arbitrary")),
    )(q, k, v)


# ----------------------------------------------------------------------------
# LlamaAttention forward (wrapper)
# ----------------------------------------------------------------------------
class LlamaAttentionPallas:
    def __init__(self, hidden_size, num_attention_heads, num_key_value_heads,
                 rope_theta=10000.0, key=None):
        self.hidden_size = hidden_size
        self.num_heads = num_attention_heads
        self.head_dim = hidden_size // num_attention_heads
        self.num_key_value_heads = num_key_value_heads
        self.num_key_value_groups = self.num_heads // num_key_value_heads
        self.rope_theta = rope_theta
        assert self.head_dim * self.num_heads == hidden_size

        k0, k1, k2, k3 = jax.random.split(key, 4)
        init = 1.0 / math.sqrt(hidden_size)
        # Weights stored (in_features, out_features); attention_bias=False.
        self.wq = jax.random.normal(
            k0, (hidden_size, self.num_heads * self.head_dim), jnp.float32) * init
        self.wk = jax.random.normal(
            k1, (hidden_size, self.num_key_value_heads * self.head_dim),
            jnp.float32) * init
        self.wv = jax.random.normal(
            k2, (hidden_size, self.num_key_value_heads * self.head_dim),
            jnp.float32) * init
        self.wo = jax.random.normal(
            k3, (self.num_heads * self.head_dim, hidden_size), jnp.float32) * init

        # Fused Q|K|V weight (x read from HBM once) stored bf16 for the MXU.
        self.w_qkv_bf16 = jnp.concatenate(
            [self.wq, self.wk, self.wv], axis=1).astype(jnp.bfloat16)
        self.wo_bf16 = self.wo.astype(jnp.bfloat16)

    def __call__(self, hidden_states):
        B, S, H = hidden_states.shape
        D = self.head_dim
        NH, NKV = self.num_heads, self.num_key_value_heads
        NHT = NH + 2 * NKV

        x2d = hidden_states.reshape(B * S, H).astype(jnp.bfloat16)

        # 1) Fused Q|K|V projection: one tiled Pallas matmul, bf16 out.
        qkv = matmul(x2d, self.w_qkv_bf16, jnp.bfloat16)       # (B*S, NHT*D)
        qkv = qkv.reshape(B, S, NHT * D)                        # free reshape

        # 2) RoPE + scale + head-major relayout pre-pass (Pallas kernel).
        cos, sin_signed = rope_tables(S, D, self.rope_theta)
        q_rot, k_rot, v_hm = rope_split(
            qkv, cos, sin_signed, B=B, S=S, NH=NH, NKV=NKV, D=D,
            scale=1.0 / math.sqrt(D))

        # 3) Flash attention (GQA-group batched, causal-clamped K/V DMA).
        attn = flash_attention(q_rot, k_rot, v_hm, B=B, S=S, NH=NH, NKV=NKV,
                               D=D)                             # (B, S, NH*D)

        # 4) Output projection (tiled Pallas matmul, bf16 residual-stream out).
        out = matmul(attn.reshape(B * S, NH * D), self.wo_bf16, jnp.bfloat16)
        return out.reshape(B, S, H)


# ----------------------------------------------------------------------------
# Pure-JAX fp32 reference (uses the same bf16-quantized weights/activations)
# ----------------------------------------------------------------------------
def rotate_half_ref(x):
    d = x.shape[-1] // 2
    return jnp.concatenate([-x[..., d:], x[..., :d]], axis=-1)


def apply_rotary_ref(x, cos, sin):
    return x * cos[None, None] + rotate_half_ref(x) * sin[None, None]


def reference_forward(mod, hidden_states):
    B, S, H = hidden_states.shape
    D = mod.head_dim
    f32 = lambda a: a.astype(jnp.bfloat16).astype(jnp.float32)
    x2d = f32(hidden_states).reshape(B * S, H)
    wq, wk, wv, wo = f32(mod.wq), f32(mod.wk), f32(mod.wv), f32(mod.wo)
    q = (x2d @ wq).reshape(B, S, mod.num_heads, D).transpose(0, 2, 1, 3)
    k = (x2d @ wk).reshape(B, S, mod.num_key_value_heads, D).transpose(0, 2, 1, 3)
    v = (x2d @ wv).reshape(B, S, mod.num_key_value_heads, D).transpose(0, 2, 1, 3)
    cos, sin = rope_cos_sin_ref(S, D, mod.rope_theta)
    q = apply_rotary_ref(q, cos, sin)
    k = apply_rotary_ref(k, cos, sin)
    k = jnp.repeat(k, mod.num_key_value_groups, axis=1)
    v = jnp.repeat(v, mod.num_key_value_groups, axis=1)
    s = jnp.einsum("bhqd,bhkd->bhqk", q, k) / math.sqrt(D)
    mask = jnp.tril(jnp.ones((S, S), bool))
    s = jnp.where(mask[None, None], s, -1e30)
    p = jax.nn.softmax(s, axis=-1)
    o = jnp.einsum("bhqk,bhkd->bhqd", p, v)
    o = o.transpose(0, 2, 1, 3).reshape(B * S, H)
    return (o @ wo).reshape(B, S, H)


if __name__ == "__main__":
    # Small config with lane-dense head_dim=128 so the real tile paths run:
    # hidden=256, 2 q heads, 1 kv head (GQA group=2), B=2, S=512 with
    # tq=tkv=256 -> 2x2 q/kv block grid, causal block skip + DMA clamp,
    # multi-block matmuls.
    key = jax.random.PRNGKey(0)
    k_w, k_x = jax.random.split(key)

    mod = LlamaAttentionPallas(
        hidden_size=256,
        num_attention_heads=2,
        num_key_value_heads=1,
        rope_theta=10000.0,
        key=k_w,
    )

    B, S, H = 2, 512, 256
    x = jax.random.normal(k_x, (B, S, H), jnp.float32)

    out = jax.block_until_ready(mod(x))

    ref = reference_forward(mod, x)
    assert out.shape == (B, S, H)
    assert jnp.allclose(out.astype(jnp.float32), ref, atol=5e-2, rtol=5e-2), \
        "mismatch vs reference"

    # TODO(synk): kv_cache / graph_cache speculative-decoding paths (spec=True,
    # GraphFlashTopKCache etc.) need the cache classes; only the dense prefill
    # path (empty cache, position_ids = arange(S)) is implemented here.
    print("KERNEL_OK")
</pallas_src>

<mosaic_0001>
module attributes {stable_mosaic.version = 11 : i64} {
  func.func @_matmul_kernel(%arg0: i32, %arg1: i32, %arg2: i32, %arg3: memref<512x256xbf16, #tpu.memory_space<vmem>>, %arg4: memref<256x512xbf16, #tpu.memory_space<vmem>>, %arg5: memref<512x512xbf16, #tpu.memory_space<vmem>>, %arg6: memref<512x512xf32, #tpu.memory_space<vmem>>) attributes {dimension_semantics = [#tpu.dimension_semantics<parallel>, #tpu.dimension_semantics<parallel>, #tpu.dimension_semantics<arbitrary>], iteration_bounds = array<i64: 2, 1, 1>, scalar_prefetch = 0 : i64, scratch_operands = 1 : i64, tpu.core_type = #tpu.core_type<tc>, window_params = [{transform_indices = @transform_0, window_bounds = array<i64: 512, 256>}, {transform_indices = @transform_1, window_bounds = array<i64: 256, 512>}, {transform_indices = @transform_2, window_bounds = array<i64: 512, 512>}]} {
    %c0_i32 = arith.constant 0 : i32
    %0 = arith.cmpi eq, %arg2, %c0_i32 : i32
    %1 = arith.extui %0 : i1 to i32
    %c0_i32_0 = arith.constant 0 : i32
    %2 = arith.cmpi ne, %1, %c0_i32_0 : i32
    scf.if %2 {
      %cst_10 = arith.constant 0.000000e+00 : f32
      %12 = vector.broadcast %cst_10 : f32 to vector<512x512xf32>
      %c0_11 = arith.constant 0 : index
      %c0_12 = arith.constant 0 : index
      %13 = vector.load %arg6[%c0_11, %c0_12] : memref<512x512xf32, #tpu.memory_space<vmem>>, vector<512x512xf32>
      tpu.vector_store %arg6[%c0_11, %c0_12], %12 {strides = array<i32>} : memref<512x512xf32, #tpu.memory_space<vmem>>, vector<512x512xf32>,
    } else {
    }
    %c0 = arith.constant 0 : index
    %c0_1 = arith.constant 0 : index
    %3 = vector.load %arg6[%c0, %c0_1] : memref<512x512xf32, #tpu.memory_space<vmem>>, vector<512x512xf32>
    %c0_2 = arith.constant 0 : index
    %c0_3 = arith.constant 0 : index
    %4 = vector.load %arg3[%c0_2, %c0_3] : memref<512x256xbf16, #tpu.memory_space<vmem>>, vector<512x256xbf16>
    %c0_4 = arith.constant 0 : index
    %c0_5 = arith.constant 0 : index
    %5 = vector.load %arg4[%c0_4, %c0_5] : memref<256x512xbf16, #tpu.memory_space<vmem>>, vector<256x512xbf16>
    %cst = arith.constant dense<0.000000e+00> : vector<512x512xf32>
    %6 = tpu.matmul %4, %5, %cst {dimension_numbers = #tpu.dot_dimension_numbers<[1], [0], [0], [1], [0, 0, 1, 1], [], []>} : vector<512x256xbf16>, vector<256x512xbf16>, vector<512x512xf32> -> vector<512x512xf32>
    %7 = arith.addf %3, %6 : vector<512x512xf32>
    %c0_6 = arith.constant 0 : index
    %c0_7 = arith.constant 0 : index
    %8 = vector.load %arg6[%c0_6, %c0_7] : memref<512x512xf32, #tpu.memory_space<vmem>>, vector<512x512xf32>
    tpu.vector_store %arg6[%c0_6, %c0_7], %7 {strides = array<i32>} : memref<512x512xf32, #tpu.memory_space<vmem>>, vector<512x512xf32>,
    %c0_i32_8 = arith.constant 0 : i32
    %9 = arith.cmpi eq, %arg2, %c0_i32_8 : i32
    %10 = arith.extui %9 : i1 to i32
    %c0_i32_9 = arith.constant 0 : i32
    %11 = arith.cmpi ne, %10, %c0_i32_9 : i32
    scf.if %11 {
      %c0_10 = arith.constant 0 : index
      %c0_11 = arith.constant 0 : index
      %12 = vector.load %arg6[%c0_10, %c0_11] : memref<512x512xf32, #tpu.memory_space<vmem>>, vector<512x512xf32>
      %13 = arith.truncf %12 : vector<512x512xf32> to vector<512x512xbf16>
      %c0_12 = arith.constant 0 : index
      %c0_13 = arith.constant 0 : index
      %14 = vector.load %arg5[%c0_12, %c0_13] : memref<512x512xbf16, #tpu.memory_space<vmem>>, vector<512x512xbf16>
      tpu.vector_store %arg5[%c0_12, %c0_13], %13 {strides = array<i32>} : memref<512x512xbf16, #tpu.memory_space<vmem>>, vector<512x512xbf16>,
    } else {
    }
    return
  }
  func.func @transform_0(%arg0: i32, %arg1: i32, %arg2: i32) -> (i32, i32) {
    %c0_i32 = arith.constant 0 : i32
    return %arg0, %arg2 : i32, i32
  }
  func.func @transform_1(%arg0: i32, %arg1: i32, %arg2: i32) -> (i32, i32) {
    %c0_i32 = arith.constant 0 : i32
    return %arg2, %arg1 : i32, i32
  }
  func.func @transform_2(%arg0: i32, %arg1: i32, %arg2: i32) -> (i32, i32) {
    %c0_i32 = arith.constant 0 : i32
    return %arg0, %arg1 : i32, i32
  }
}

</mosaic_0001>

<bundles_post_ra>
// kernel: tpu_custom_call.1
= control target key start
LH: loop header
LB: loop body
LE: loop exit
PB: predicated region body
PF: predicated region fallthrough
CT: control target
= control target key end

     0   :  { %7 = vsyncpa [#allocation4], 0  ;;  %s5720_s0 = inlined_call_operand.hbm [shape: bf16[1024,256], index: 0, kind: input, shape index: {}]   ;;  %s5721_s1 = inlined_call_operand.hbm [shape: bf16[256,512], index: 1, kind: input, shape index: {}]   ;;  %s5722_s2 = inlined_call_operand.hbm [shape: bf16[1024,512], index: 2, kind: output, shape index: {}]  }
   0x1   :  { %9 = vsyncpa [#allocation4 + $0x1], 0 }
   0x2   :  { %10 = vsyncpa [#allocation7], 0 }
   0x3   :  { %11 = vsyncpa [#allocation5], 0 }
   0x4   :  { %13 = vsyncpa [#allocation5 + $0x1], 0  ;;  %s4925_s9 = smov 0   ;;  %s4927_s10 = smov 0  }
   0x5   :  { %s4929_s11 = smov 0   ;;  %s4931_s12 = smov 0  }
   0x6   :  { %s4933_s13 = smov 0   ;;  %s4935_s14 = smov 0  }
   0x7 LB: > { %s4013_s15 = sadd.s32 4294967295, %s4901_s14   ;;  %s4014_s16 = sadd.s32 4294967294, %s4901_s14   ;;  %s4901_s14 = sphi %s4935_s14, %s19_s14   ;;  %s4897_s13 = sphi %s4933_s13, %s5802_s13   ;;  %s4893_s12 = sphi %s4931_s12, %s5801_s12   ;;  %s4889_s11 = sphi %s4929_s11, %s5800_s11   ;;  %s4885_s10 = sphi %s4927_s10, %s5799_s10   ;;  %s4881_s9 = sphi %s4925_s9, %s5798_s9  }
   0x8   : > { %p60_p0 = scmp.ne.s32.totalorder %s4885_s10, %s4881_s9  ;;  %p4959_p1 = scmp.eq.s32.totalorder %s4013_s15, 0 }
   0x9   : > { %p4963_p2 = scmp.eq.s32.totalorder %s4013_s15, 1  ;;  %p120_p3 = scmp.eq.s32.totalorder %s4014_s16, 1 }
   0xa   : > { %p4969_p4 = por %p4959_p1, %p60_p0  ;;  %p4015_p5 = scmp.ge.s32.totalorder %s4901_s14, 1 }
   0xb   : > { %p4974_p6 = por %p120_p3, %p60_p0  ;;  %p127_p7 = scmp.lt.s32.totalorder %s4901_s14, 3 }
   0xc   : > { %s144_s23 = sshll.u32 %s5721_s1, 4  ;;  %s4903_s25 = smov [#allocation6]   ;;  %s145_s23 = int_to_ptr.hbm [resolvable:$true] %s144_s23 }
   0xd   : > { %p4982_p8 = pnand %p4015_p5, %p127_p7  ;;  %s146_s26 = sshll.u32 %s4903_s25, 4  ;;  %s147_s26 = int_to_ptr.vmem [resolvable:$true] %s146_s26 }
   0xe   : > { %p4017_p11 = scmp.ge.s32.totalorder %s4901_s14, 2  ;;  %s4904_s27 = smov 256  }
   0xf   : > { %p4684_p9 = pneg %p4982_p8  ;;  %s4905_s28 = smov 16  }
  0x10   : > { %s38_s29 = sadd.s32 1, %s4897_s13  ;;  %s47_s30 = sadd.s32 1, %s4889_s11 }
  0x11   : > { %p4685_p10 = pnand %p4684_p9, %p4959_p1  ;;  %p40_p12 = scmp.ge.s32.totalorder %s38_s29, 2 }
  0x12   : > { %p54_p13 = scmp.ne.s32.totalorder %s4889_s11, %s4885_s10  ;;  %p55_p0 = scmp.eq.s32.totalorder %s4901_s14, 0 }
  0x13   : > { %4687 = dma.hbm_to_vmem [thread:$0]  (!%p4685_p10), %s145_s23, 8192, %s147_s26, [#allocation7], %s4904_s27, %s4904_s27, %s4905_s28  }
  0x14   : > { %s5804_s29 = smov (%p40_p12, %s38_s29), 0  ;;  %p4998_p3 = por %p55_p0, %p54_p13 }
  0x15   : > { %p5004_p5 = por %p4963_p2, %p54_p13  ;;  %s42_s5 = ssub.s32 %s4897_s13, %s5804_s29 }
  0x16   : > { %p4697_p7 = scmp.lt.s32.totalorder %s4901_s14, 2  ;;  %p45_p9 = scmp.eq.s32.totalorder %s42_s5, 0 }
  0x17   : > { %s160_s6 = sand.u32 1, %s4889_s11   ;;  %s4545_s15 = sshll.u32 %s4897_s13, 9 }
  0x18   : > { %s4018_s7 = sshll.u32 %s160_s6, 9  ;;  %s172_s22 = scalar_lea.hbm %s5720_s0, %s4545_s15 }
  0x19   : > { %s5013_s8 = scalar_select %p45_p9, %s4889_s11, %s47_s30  }
  0x1a   : > { %s164_s23 = scalar_lea.vmem [#allocation3], %s4018_s7  ;;  %s173_s18 = sshll.u32 %s172_s22, 4  ;;  %s174_s18 = int_to_ptr.hbm [resolvable:$true] %s173_s18 }
  0x1b   : > { %s175_s25 = sshll.u32 %s164_s23, 4  ;;  %p4689_p2 = pnand %p4697_p7, %p4998_p3  ;;  %s176_s25 = int_to_ptr.vmem [resolvable:$true] %s175_s25 }
  0x1c   : > { %s161_s26 = scalar_lea.sflag [#allocation4], %s160_s6  ;;  %s4906_s27 = smov 128  }
  0x1d   : > { %s4907_s28 = smov 8   ;;  %187 = sbr.rel (%p4982_p8) target bundleno = 1233 (0x4d1), region = 28 }
  0x1e   : > { %4691 = dma.hbm_to_vmem [thread:$0]  (!%p4689_p2), %s174_s18, 8192, %s176_s25, %s161_s26, %s4906_s27, %s4906_s27, %s4907_s28  }
  0x22   : > { %s5024_s30 = sand.u32 1, %s4885_s10  }
  0x23   : > { %s4023_s5 = sshll.u32 %s5024_s30, 9  ;;  %s190_s7 = scalar_lea.sflag [#allocation4], %s5024_s30 }
  0x24   : > { %s5028_s15 = scalar_lea.vmem [#allocation3], %s4023_s5 }
  0x25   : > { %4868 = dma.done.wait (%p4969_p4), %s190_s7, 8192  }
  0x26   : > { %4870 = vsyncadd (%p4969_p4), %s190_s7, 4294959104 }
  0x27   : > { %4872 = dma.done.wait (%p4959_p1), [#allocation7], 8192  }
  0x28   : > { %4874 = vsyncadd (%p4959_p1), [#allocation7], 4294959104  ;;  %v4396_v0 = vld [vmem:[#allocation6 + $0xe0] sm:$0xf]  ;;  %v4640_v1 = vld [vmem:[#allocation6 + $0xec] sm:$0xf0] }
  0x29   : > { %v4524_v2 = vld [vmem:[#allocation6 + $0x1e0] sm:$0xf]  ;;  %v4397_v3 = vor.u32 %v4640_v1, %v4396_v0  ;;  %v4672_v4 = vld [vmem:[#allocation6 + $0x1ec] sm:$0xf0]  ;;  %v4638_v5 = vld [vmem:[#allocation6 + $0xe4] sm:$0xf] }
  0x2a   : > { %v4398_v6 = vld [vmem:[#allocation6 + $0xf0] sm:$0xf0]  ;;  %v4525_v7 = vor.u32 %v4672_v4, %v4524_v2  ;;  %v4670_v9 = vld [vmem:[#allocation6 + $0x1e4] sm:$0xf]  ;;  %v4380_v11 = vld [vmem:[#allocation6 + $0xc0] sm:$0xf] }
  0x2b   : > { %v4401_v8 = vor.u32 %v4638_v5, %v4398_v6  ;;  %v4526_v10 = vld [vmem:[#allocation6 + $0x1f0] sm:$0xf0]  ;;  %1510 = vmatpush.bf16.msra.mxu0 %v4397_v3  ;;  %v4636_v13 = vld [vmem:[#allocation6 + $0xcc] sm:$0xf0]  ;;  %v4508_v14 = vld [vmem:[#allocation6 + $0x1c0] sm:$0xf] }
  0x2c   : > { %v4529_v12 = vor.u32 %v4670_v9, %v4526_v10  ;;  %v4668_v15 = vld [vmem:[#allocation6 + $0x1cc] sm:$0xf0]  ;;  %1679 = vmatpush.bf16.msra.mxu1 %v4525_v7  ;;  %v4381_v16 = vor.u32 %v4636_v13, %v4380_v11  ;;  %v4634_v18 = vld [vmem:[#allocation6 + $0xc4] sm:$0xf]  ;;  %v4382_v19 = vld [vmem:[#allocation6 + $0xd0] sm:$0xf0] }
  0x2d   : > { %1848 = vmatpush.bf16.msra.mxu2 %v4401_v8  ;;  %v4509_v17 = vor.u32 %v4668_v15, %v4508_v14  ;;  %v4666_v20 = vld [vmem:[#allocation6 + $0x1c4] sm:$0xf]  ;;  %v4385_v21 = vor.u32 %v4634_v18, %v4382_v19  ;;  %v4510_v22 = vld [vmem:[#allocation6 + $0x1d0] sm:$0xf0]  ;;  %v4364_v23 = vld [vmem:[#allocation6 + $0xa0] sm:$0xf] }
  0x2e   : > { %2017 = vmatpush.bf16.msra.mxu3 %v4529_v12  ;;  %v4632_v24 = vld [vmem:[#allocation6 + $0xac] sm:$0xf0]  ;;  %v4513_v25 = vor.u32 %v4666_v20, %v4510_v22  ;;  %v4492_v26 = vld [vmem:[#allocation6 + $0x1a0] sm:$0xf]  ;;  %v4630_v28 = vld [vmem:[#allocation6 + $0xa4] sm:$0xf] }
  0x2f   : > { %v4664_v27 = vld [vmem:[#allocation6 + $0x1ac] sm:$0xf0]  ;;  %1511 = vmatpush.bf16.msra.mxu0 %v4381_v16  ;;  %v4365_v29 = vor.u32 %v4632_v24, %v4364_v23  ;;  %v4366_v30 = vld [vmem:[#allocation6 + $0xb0] sm:$0xf0]  ;;  %v4662_v31 = vld [vmem:[#allocation6 + $0x1a4] sm:$0xf] }
  0x30   : > { %v4494_v32 = vld [vmem:[#allocation6 + $0x1b0] sm:$0xf0]  ;;  %1680 = vmatpush.bf16.msra.mxu1 %v4509_v17  ;;  %v4493_v33 = vor.u32 %v4664_v27, %v4492_v26  ;;  %v4369_v34 = vor.u32 %v4630_v28, %v4366_v30  ;;  %v4348_v35 = vld [vmem:[#allocation6 + $0x80] sm:$0xf]  ;;  %v4628_v36 = vld [vmem:[#allocation6 + $0x8c] sm:$0xf0] }
  0x31   : > { %1849 = vmatpush.bf16.msra.mxu2 %v4385_v21  ;;  %v4476_v37 = vld [vmem:[#allocation6 + $0x180] sm:$0xf]  ;;  %v4497_v38 = vor.u32 %v4662_v31, %v4494_v32  ;;  %v4660_v39 = vld [vmem:[#allocation6 + $0x18c] sm:$0xf0]  ;;  %v4626_v40 = vld [vmem:[#allocation6 + $0x84] sm:$0xf]  ;;  %v4349_v44 = vor.u32 %v4628_v36, %v4348_v35 }
  0x32   : > { %2018 = vmatpush.bf16.msra.mxu3 %v4513_v25  ;;  %v4350_v41 = vld [vmem:[#allocation6 + $0x90] sm:$0xf0]  ;;  %v4658_v42 = vld [vmem:[#allocation6 + $0x184] sm:$0xf]  ;;  %v4477_v45 = vor.u32 %v4660_v39, %v4476_v37  ;;  %v4332_v47 = vld [vmem:[#allocation6 + $0x60] sm:$0xf] }
  0x33   : > { %v4478_v43 = vld [vmem:[#allocation6 + $0x190] sm:$0xf0]  ;;  %1512 = vmatpush.bf16.msra.mxu0 %v4365_v29  ;;  %v4353_v46 = vor.u32 %v4626_v40, %v4350_v41  ;;  %v4624_v48 = vld [vmem:[#allocation6 + $0x6c] sm:$0xf0]  ;;  %v4460_v49 = vld [vmem:[#allocation6 + $0x160] sm:$0xf] }
  0x34   : > { %1681 = vmatpush.bf16.msra.mxu1 %v4493_v33  ;;  %v4481_v50 = vor.u32 %v4658_v42, %v4478_v43  ;;  %v4656_v51 = vld [vmem:[#allocation6 + $0x16c] sm:$0xf0]  ;;  %v4622_v52 = vld [vmem:[#allocation6 + $0x64] sm:$0xf]  ;;  %v4334_v53 = vld [vmem:[#allocation6 + $0x70] sm:$0xf0]  ;;  %v4333_v56 = vor.u32 %v4624_v48, %v4332_v47 }
  0x35   : > { %1850 = vmatpush.bf16.msra.mxu2 %v4369_v34  ;;  %v4654_v54 = vld [vmem:[#allocation6 + $0x164] sm:$0xf]  ;;  %v4462_v55 = vld [vmem:[#allocation6 + $0x170] sm:$0xf0]  ;;  %v4461_v57 = vor.u32 %v4656_v51, %v4460_v49  ;;  %v4337_v58 = vor.u32 %v4622_v52, %v4334_v53  ;;  %v4316_v59 = vld [vmem:[#allocation6 + $0x40] sm:$0xf] }
  0x36   : > { %2019 = vmatpush.bf16.msra.mxu3 %v4497_v38  ;;  %v4620_v60 = vld [vmem:[#allocation6 + $0x4c] sm:$0xf0]  ;;  %v4444_v61 = vld [vmem:[#allocation6 + $0x140] sm:$0xf]  ;;  %v4465_v62 = vor.u32 %v4654_v54, %v4462_v55  ;;  %v4618_v0 = vld [vmem:[#allocation6 + $0x44] sm:$0xf] }
  0x37   : > { %1513 = vmatpush.bf16.msra.mxu0 %v4349_v44  ;;  %v4652_v63 = vld [vmem:[#allocation6 + $0x14c] sm:$0xf0]  ;;  %v4318_v1 = vld [vmem:[#allocation6 + $0x50] sm:$0xf0]  ;;  %v4650_v2 = vld [vmem:[#allocation6 + $0x144] sm:$0xf]  ;;  %v4317_v4 = vor.u32 %v4620_v60, %v4316_v59 }
  0x38   : > { %1682 = vmatpush.bf16.msra.mxu1 %v4477_v45  ;;  %v4446_v3 = vld [vmem:[#allocation6 + $0x150] sm:$0xf0]  ;;  %v4445_v5 = vor.u32 %v4652_v63, %v4444_v61  ;;  %v4321_v6 = vor.u32 %v4618_v0, %v4318_v1  ;;  %v4300_v7 = vld [vmem:[#allocation6 + $0x20] sm:$0xf]  ;;  %v4616_v8 = vld [vmem:[#allocation6 + $0x2c] sm:$0xf0] }
  0x39   : > { %1851 = vmatpush.bf16.msra.mxu2 %v4353_v46  ;;  %v4428_v9 = vld [vmem:[#allocation6 + $0x120] sm:$0xf]  ;;  %v4449_v10 = vor.u32 %v4650_v2, %v4446_v3  ;;  %v4648_v11 = vld [vmem:[#allocation6 + $0x12c] sm:$0xf0]  ;;  %v4614_v12 = vld [vmem:[#allocation6 + $0x24] sm:$0xf]  ;;  %v4301_v16 = vor.u32 %v4616_v8, %v4300_v7 }
  0x3a   : > { %2020 = vmatpush.bf16.msra.mxu3 %v4481_v50  ;;  %v4302_v13 = vld [vmem:[#allocation6 + $0x30] sm:$0xf0]  ;;  %v4646_v14 = vld [vmem:[#allocation6 + $0x124] sm:$0xf]  ;;  %v4284_v17 = vld [vmem:[#allocation6] sm:$0xf]  ;;  %v4429_v19 = vor.u32 %v4648_v11, %v4428_v9 }
  0x3b   : > { %1514 = vmatpush.bf16.msra.mxu0 %v4333_v56  ;;  %v4430_v15 = vld [vmem:[#allocation6 + $0x130] sm:$0xf0]  ;;  %v4612_v18 = vld [vmem:[#allocation6 + $0xc] sm:$0xf0]  ;;  %v4305_v20 = vor.u32 %v4614_v12, %v4302_v13  ;;  %v4412_v21 = vld [vmem:[#allocation6 + $0x100] sm:$0xf] }
  0x3c   : > { %1683 = vmatpush.bf16.msra.mxu1 %v4461_v57  ;;  %v4644_v22 = vld [vmem:[#allocation6 + $0x10c] sm:$0xf0]  ;;  %v4610_v23 = vld [vmem:[#allocation6 + $0x4] sm:$0xf]  ;;  %v4433_v24 = vor.u32 %v4646_v14, %v4430_v15  ;;  %v4286_v25 = vld [vmem:[#allocation6 + $0x10] sm:$0xf0]  ;;  %v4285_v31 = vor.u32 %v4612_v18, %v4284_v17 }
  0x3d   : > { %1852 = vmatpush.bf16.msra.mxu2 %v4337_v58  ;;  %v4642_v26 = vld [vmem:[#allocation6 + $0x104] sm:$0xf]  ;;  %v4414_v27 = vld [vmem:[#allocation6 + $0x110] sm:$0xf0]  ;;  %v4028_v28 = vld [vmem:[%s5028_s15] sm:$0xf]  ;;  %v4413_v35 = vor.u32 %v4644_v22, %v4412_v21  ;;  %v4289_v36 = vor.u32 %v4610_v23, %v4286_v25 }
  0x3e   : > { %2021 = vmatpush.bf16.msra.mxu3 %v4465_v62  ;;  %v4639_v29 = vld [vmem:[#allocation6 + $0xec] sm:$0xf]  ;;  %v4406_v30 = vld [vmem:[#allocation6 + $0xf8] sm:$0xf0]  ;;  %v4547_v32 = vld [vmem:[%s5028_s15 + $0x4] sm:$0xf0]  ;;  %v4417_v39 = vor.u32 %v4642_v26, %v4414_v27 }
  0x3f   : > { %1515 = vmatpush.bf16.msra.mxu0 %v4317_v4  ;;  %v4671_v33 = vld [vmem:[#allocation6 + $0x1ec] sm:$0xf]  ;;  %v4534_v34 = vld [vmem:[#allocation6 + $0x1f8] sm:$0xf0]  ;;  %v4546_v37 = vld [vmem:[%s5028_s15 + $0x4] sm:$0xf]  ;;  %v4409_v40 = vor.u32 %v4639_v29, %v4406_v30  ;;  %v5042_v43 = vor.u32 %v4547_v32, %v4028_v28 }
  0x40   : > { %1684 = vmatpush.bf16.msra.mxu1 %v4445_v5  ;;  %v4030_v38 = vld [vmem:[%s5028_s15 + $0x8] sm:$0xf0]  ;;  %v4404_v41 = vld [vmem:[#allocation6 + $0xe8] sm:$0xf]  ;;  %v4641_v42 = vld [vmem:[#allocation6 + $0xf4] sm:$0xf0]  ;;  %v4537_v44 = vor.u32 %v4671_v33, %v4534_v34 }
  0x41   : > { %1853 = vmatpush.bf16.msra.mxu2 %v4321_v6  ;;  %v4532_v45 = vld [vmem:[#allocation6 + $0x1e8] sm:$0xf]  ;;  %v4673_v46 = vld [vmem:[#allocation6 + $0x1f4] sm:$0xf0]  ;;  %v5044_v47 = vor.u32 %v4546_v37, %v4030_v38  ;;  %v4405_v48 = vor.u32 %v4641_v42, %v4404_v41  ;;  %v4036_v50 = vld [vmem:[%s5028_s15 + $0x10] sm:$0xf] }
  0x42   : > { %2022 = vmatpush.bf16.msra.mxu3 %v4449_v10  ;;  %v4533_v49 = vor.u32 %v4673_v46, %v4532_v45  ;;  %v4549_v51 = vld [vmem:[%s5028_s15 + $0x14] sm:$0xf0]  ;;  %v4548_v52 = vld [vmem:[%s5028_s15 + $0x14] sm:$0xf]  ;;  %v4038_v53 = vld [vmem:[%s5028_s15 + $0x18] sm:$0xf0] }
  0x43   : > { %1516 = vmatpush.bf16.msra.mxu0 %v4301_v16  ;;  %v5054_v54 = vor.u32 %v4549_v51, %v4036_v50  ;;  %v5056_v55 = vor.u32 %v4548_v52, %v4038_v53  ;;  %v4044_v56 = vld [vmem:[%s5028_s15 + $0x20] sm:$0xf]  ;;  %v4551_v57 = vld [vmem:[%s5028_s15 + $0x24] sm:$0xf0]  ;;  %v4550_v58 = vld [vmem:[%s5028_s15 + $0x24] sm:$0xf] }
  0x44   : > { %1685 = vmatpush.bf16.msra.mxu1 %v4429_v19  ;;  %v4046_v59 = vld [vmem:[%s5028_s15 + $0x28] sm:$0xf0]  ;;  %v5066_v60 = vor.u32 %v4551_v57, %v4044_v56  ;;  %v4390_v63 = vld [vmem:[#allocation6 + $0xd8] sm:$0xf0]  ;;  %v4388_v3 = vld [vmem:[#allocation6 + $0xc8] sm:$0xf] }
  0x45   : > { %1854 = vmatpush.bf16.msra.mxu2 %v4305_v20  ;;  %v5068_v61 = vor.u32 %v4550_v58, %v4046_v59  ;;  %v4635_v62 = vld [vmem:[#allocation6 + $0xcc] sm:$0xf]  ;;  %v4518_v2 = vld [vmem:[#allocation6 + $0x1d8] sm:$0xf0]  ;;  %v4637_v4 = vld [vmem:[#allocation6 + $0xd4] sm:$0xf0] }
  0x46   : > { %2023 = vmatpush.bf16.msra.mxu3 %v4433_v24  ;;  %v4667_v0 = vld [vmem:[#allocation6 + $0x1cc] sm:$0xf]  ;;  %v4393_v1 = vor.u32 %v4635_v62, %v4390_v63  ;;  %v4389_v6 = vor.u32 %v4637_v4, %v4388_v3  ;;  %v4516_v7 = vld [vmem:[#allocation6 + $0x1c8] sm:$0xf]  ;;  %v4669_v8 = vld [vmem:[#allocation6 + $0x1d4] sm:$0xf0] }
  0x47   : > { %1517 = vmatpush.bf16.msra.mxu0 %v4285_v31  ;;  %v4521_v5 = vor.u32 %v4667_v0, %v4518_v2  ;;  %v4517_v9 = vor.u32 %v4669_v8, %v4516_v7  ;;  %v4052_v10 = vld [vmem:[%s5028_s15 + $0x30] sm:$0xf]  ;;  %v4553_v11 = vld [vmem:[%s5028_s15 + $0x34] sm:$0xf0]  ;;  %v4552_v12 = vld [vmem:[%s5028_s15 + $0x34] sm:$0xf] }
  0x48   : > { %1686 = vmatpush.bf16.msra.mxu1 %v4413_v35  ;;  %v4054_v13 = vld [vmem:[%s5028_s15 + $0x38] sm:$0xf0]  ;;  %v5078_v14 = vor.u32 %v4553_v11, %v4052_v10  ;;  %v4060_v16 = vld [vmem:[%s5028_s15 + $0x40] sm:$0xf]  ;;  %v4555_v17 = vld [vmem:[%s5028_s15 + $0x44] sm:$0xf0] }
  0x49   : > { %1855 = vmatpush.bf16.msra.mxu2 %v4289_v36  ;;  %v5080_v15 = vor.u32 %v4552_v12, %v4054_v13  ;;  %v4554_v18 = vld [vmem:[%s5028_s15 + $0x44] sm:$0xf]  ;;  %v4062_v19 = vld [vmem:[%s5028_s15 + $0x48] sm:$0xf0]  ;;  %v5090_v20 = vor.u32 %v4555_v17, %v4060_v16  ;;  %v4068_v22 = vld [vmem:[%s5028_s15 + $0x50] sm:$0xf] }
  0x4a   : > { %2024 = vmatpush.bf16.msra.mxu3 %v4417_v39  ;;  %1518 = vmatmul.bf16.vlgmr.msra.gmra.mxu0 %v5042_v43  ;;  %v5092_v21 = vor.u32 %v4554_v18, %v4062_v19  ;;  %v4557_v23 = vld [vmem:[%s5028_s15 + $0x54] sm:$0xf0]  ;;  %v4556_v24 = vld [vmem:[%s5028_s15 + $0x54] sm:$0xf]  ;;  %v4070_v25 = vld [vmem:[%s5028_s15 + $0x58] sm:$0xf0] }
  0x4b   : > { %1687 = vmatmul.bf16.vlgmr.msra.gmra.mxu1 %v5044_v47  ;;  %2186 = vmatpush.bf16.msrb.mxu0 %v4405_v48  ;;  %v5102_v26 = vor.u32 %v4557_v23, %v4068_v22  ;;  %v5104_v27 = vor.u32 %v4556_v24, %v4070_v25  ;;  %v4076_v28 = vld [vmem:[%s5028_s15 + $0x60] sm:$0xf]  ;;  %v4559_v29 = vld [vmem:[%s5028_s15 + $0x64] sm:$0xf0]  ;;  %v4558_v30 = vld [vmem:[%s5028_s15 + $0x64] sm:$0xf] }
  0x4c   : > { %1856 = vmatmul.bf16.vlgmr.msra.gmra.mxu2 %v5042_v43  ;;  %2355 = vmatpush.bf16.msrb.mxu1 %v4533_v49  ;;  %v4078_v31 = vld [vmem:[%s5028_s15 + $0x68] sm:$0xf0]  ;;  %v5114_v32 = vor.u32 %v4559_v29, %v4076_v28  ;;  %v4374_v35 = vld [vmem:[#allocation6 + $0xb8] sm:$0xf0]  ;;  %v4561_v41 = vld [vmem:[%s5028_s15 + $0x74] sm:$0xf0] }
  0x4d   : > { %2524 = vmatpush.bf16.msrb.mxu2 %v4409_v40  ;;  %2025 = vmatmul.bf16.vlgmr.msra.gmra.mxu3 %v5044_v47  ;;  %v5116_v33 = vor.u32 %v4558_v30, %v4078_v31  ;;  %v4631_v34 = vld [vmem:[#allocation6 + $0xac] sm:$0xf]  ;;  %v4502_v38 = vld [vmem:[#allocation6 + $0x1b8] sm:$0xf0]  ;;  %v4084_v40 = vld [vmem:[%s5028_s15 + $0x70] sm:$0xf] }
  0x4e   : > { %2693 = vmatpush.bf16.msrb.mxu3 %v4537_v44  ;;  %v4663_v36 = vld [vmem:[#allocation6 + $0x1ac] sm:$0xf]  ;;  %v4377_v37 = vor.u32 %v4631_v34, %v4374_v35  ;;  %v4560_v42 = vld [vmem:[%s5028_s15 + $0x74] sm:$0xf]  ;;  %v4086_v44 = vld [vmem:[%s5028_s15 + $0x78] sm:$0xf0]  ;;  %v5126_v51 = vor.u32 %v4561_v41, %v4084_v40 }
  0x4f   : > { %2187 = vmatpush.bf16.msrb.mxu0 %v4389_v6  ;;  %v4505_v39 = vor.u32 %v4663_v36, %v4502_v38  ;;  %v4372_v45 = vld [vmem:[#allocation6 + $0xa8] sm:$0xf]  ;;  %v4633_v46 = vld [vmem:[#allocation6 + $0xb4] sm:$0xf0]  ;;  %v5128_v53 = vor.u32 %v4560_v42, %v4086_v44  ;;  %v4092_v56 = vld [vmem:[%s5028_s15 + $0x80] sm:$0xf] }
  0x50   : > { %2356 = vmatpush.bf16.msrb.mxu1 %v4517_v9  ;;  %v4500_v48 = vld [vmem:[#allocation6 + $0x1a8] sm:$0xf]  ;;  %v4373_v49 = vor.u32 %v4633_v46, %v4372_v45  ;;  %v4665_v50 = vld [vmem:[#allocation6 + $0x1b4] sm:$0xf0]  ;;  %v4562_v58 = vld [vmem:[%s5028_s15 + $0x84] sm:$0xf] }
  0x51   : > { %2525 = vmatpush.bf16.msrb.mxu2 %v4393_v1  ;;  %v4501_v52 = vor.u32 %v4665_v50, %v4500_v48  ;;  %v4563_v57 = vld [vmem:[%s5028_s15 + $0x84] sm:$0xf0]  ;;  %v4094_v59 = vld [vmem:[%s5028_s15 + $0x88] sm:$0xf0]  ;;  %s4025_s17 = sshll.u32 %s5024_s30, 10  ;;  %s4675_s24 = sshll.u32 %s4893_s12, 10 }
  0x52   : > { %2694 = vmatpush.bf16.msrb.mxu3 %v4521_v5  ;;  %v5138_v62 = vor.u32 %v4563_v57, %v4092_v56  ;;  %v5140_v0 = vor.u32 %v4562_v58, %v4094_v59  ;;  %v4100_v9 = vld [vmem:[%s5028_s15 + $0x90] sm:$0xf]  ;;  %v4565_v10 = vld [vmem:[%s5028_s15 + $0x94] sm:$0xf0]  ;;  %s5149_s19 = scalar_lea.vmem [#allocation8], %s4025_s17  ;;  %s3904_s16 = scalar_lea.hbm %s5722_s2, %s4675_s24 }
  0x53   : > { %2188 = vmatpush.bf16.msrb.mxu0 %v4373_v49  ;;  %v4564_v11 = vld [vmem:[%s5028_s15 + $0x94] sm:$0xf]  ;;  %v4102_v12 = vld [vmem:[%s5028_s15 + $0x98] sm:$0xf0]  ;;  %v5154_v16 = vor.u32 %v4565_v10, %v4100_v9  ;;  %v4567_v38 = vld [vmem:[%s5028_s15 + $0xa4] sm:$0xf0] }
  0x54   : > { %2357 = vmatpush.bf16.msrb.mxu1 %v4501_v52  ;;  %v5156_v19 = vor.u32 %v4564_v11, %v4102_v12  ;;  %v4110_v40 = vld [vmem:[%s5028_s15 + $0xa8] sm:$0xf0]  ;;  %v4358_v57 = vld [vmem:[#allocation6 + $0x98] sm:$0xf0]  ;;  %v4116_v9 = vld [vmem:[%s5028_s15 + $0xb0] sm:$0xf] }
  0x55   : > { %2526 = vmatpush.bf16.msrb.mxu2 %v4377_v37  ;;  %v4108_v37 = vld [vmem:[%s5028_s15 + $0xa0] sm:$0xf]  ;;  %v4627_v56 = vld [vmem:[#allocation6 + $0x8c] sm:$0xf]  ;;  %v4569_v10 = vld [vmem:[%s5028_s15 + $0xb4] sm:$0xf0] }
  0x56   : > { %2695 = vmatpush.bf16.msrb.mxu3 %v4505_v39  ;;  %v4566_v39 = vld [vmem:[%s5028_s15 + $0xa4] sm:$0xf]  ;;  %v5168_v42 = vor.u32 %v4567_v38, %v4108_v37  ;;  %v4361_v58 = vor.u32 %v4627_v56, %v4358_v57  ;;  %v4659_v59 = vld [vmem:[#allocation6 + $0x18c] sm:$0xf]  ;;  %v4568_v11 = vld [vmem:[%s5028_s15 + $0xb4] sm:$0xf] }
  0x57   : > { %v5170_v46 = vor.u32 %v4566_v39, %v4110_v40  ;;  %v4118_v12 = vld [vmem:[%s5028_s15 + $0xb8] sm:$0xf0]  ;;  %v4126_v56 = vld [vmem:[%s5028_s15 + $0xc8] sm:$0xf0]  ;;  %s3905_s21 = sshll.u32 %s5149_s19, 4  ;;  %s3907_s22 = sshll.u32 %s3904_s16, 4  ;;  %s3906_s21 = int_to_ptr.vmem [resolvable:$true] %s3905_s21  ;;  %s3908_s22 = int_to_ptr.hbm [resolvable:$true] %s3907_s22 }
  0x58   : > { %s3890_s12 = scalar_lea.sflag [#allocation5], %s5024_s30  ;;  %s4829_s23 = sshra.s32 %s3908_s22, 4  ;;  %s4830_s23 = int_to_ptr.hbm [resolvable:$true] %s4829_s23 }
  0x59   : > { %2527 = vmatpush.bf16.msrb.mxu2 %v4361_v58  ;;  %s4831_s25 = scalar_lea.hbm %s4830_s23, 1024  ;;  %s4835_s27 = scalar_lea.hbm %s5722_s2, 2048 }
  0x5a   : > { %1523 = vmatmul.bf16.gmra.mxu0 %v5054_v54  ;;  %p4832_p1 = scmp.ne.s32.totalorder %s4830_s23, %s4831_s25  ;;  %p4836_p10 = scmp.lt.s32.totalorder %s4830_s23, %s5722_s2 }
  0x5b   : > { %1692 = vmatmul.bf16.gmra.mxu1 %v5056_v55  ;;  %p4837_p12 = scmp.lt.s32.totalorder %s4835_s27, %s4831_s25 }
  0x5c   : > { %1861 = vmatmul.bf16.gmra.mxu2 %v5054_v54  ;;  %p4833_p4 = pnand %p4832_p1, %p5004_p5 }
  0x5d   : > { %2030 = vmatmul.bf16.gmra.mxu3 %v5056_v55  ;;  %p4838_p13 = por %p4837_p12, %p4836_p10 }
  0x5e   : > { %p4834_p8 = pneg %p4833_p4 }
  0x60   : > { %p4839_p0 = pnand %p4838_p13, %p4834_p8 }
  0x6a   : > { %1528 = vmatmul.bf16.gmra.mxu0 %v5066_v60 }
  0x6b   : > { %1697 = vmatmul.bf16.gmra.mxu1 %v5068_v61 }
  0x6c   : > { %1866 = vmatmul.bf16.gmra.mxu2 %v5066_v60 }
  0x6d   : > { %2035 = vmatmul.bf16.gmra.mxu3 %v5068_v61 }
  0x7a   : > { %1533 = vmatmul.bf16.gmra.mxu0 %v5078_v14 }
  0x7b   : > { %1702 = vmatmul.bf16.gmra.mxu1 %v5080_v15 }
  0x7c   : > { %1871 = vmatmul.bf16.gmra.mxu2 %v5078_v14 }
  0x7d   : > { %2040 = vmatmul.bf16.gmra.mxu3 %v5080_v15 }
  0x8a   : > { %1538 = vmatmul.bf16.gmra.mxu0 %v5090_v20 }
  0x8b   : > { %1707 = vmatmul.bf16.gmra.mxu1 %v5092_v21 }
  0x8c   : > { %1876 = vmatmul.bf16.gmra.mxu2 %v5090_v20 }
  0x8d   : > { %2045 = vmatmul.bf16.gmra.mxu3 %v5092_v21 }
  0x9a   : > { %1543 = vmatmul.bf16.gmra.mxu0 %v5102_v26 }
  0x9b   : > { %1712 = vmatmul.bf16.gmra.mxu1 %v5104_v27 }
  0x9c   : > { %1881 = vmatmul.bf16.gmra.mxu2 %v5102_v26 }
  0x9d   : > { %2050 = vmatmul.bf16.gmra.mxu3 %v5104_v27 }
  0xaa   : > { %1548 = vmatmul.bf16.gmra.mxu0 %v5114_v32 }
  0xab   : > { %1717 = vmatmul.bf16.gmra.mxu1 %v5116_v33 }
  0xac   : > { %1886 = vmatmul.bf16.gmra.mxu2 %v5114_v32 }
  0xad   : > { %2055 = vmatmul.bf16.gmra.mxu3 %v5116_v33 }
  0xba   : > { %1553 = vmatmul.bf16.gmra.mxu0 %v5126_v51 }
  0xbb   : > { %1722 = vmatmul.bf16.gmra.mxu1 %v5128_v53 }
  0xbc   : > { %1891 = vmatmul.bf16.gmra.mxu2 %v5126_v51 }
  0xbd   : > { %2060 = vmatmul.bf16.gmra.mxu3 %v5128_v53 }
  0xc7   : > { %v1519_v63 = vpop.f32.mrf.mxu0 }
  0xc8   : > { %v1688_v1 = vpop.f32.mrf.mxu1 }
  0xc9   : > { %v1689_v2 = vadd.f32 %v1688_v1, %v1519_v63  ;;  %v4486_v63 = vld [vmem:[#allocation6 + $0x198] sm:$0xf0] }
  0xca   : > { %1558 = vmatmul.bf16.gmra.mxu0 %v5138_v62 }
  0xcb   : > { %1727 = vmatmul.bf16.gmra.mxu1 %v5140_v0 }
  0xcc   : > { %1896 = vmatmul.bf16.gmra.mxu2 %v5138_v62 }
  0xcd   : > { %2065 = vmatmul.bf16.gmra.mxu3 %v5140_v0 }
  0xcf   : > { %v1857_v3 = vpop.f32.mrf.mxu2  ;;  %v1521_v5 = vpop.f32.mrf.mxu0 }
  0xd0   : > { %v2026_v4 = vpop.f32.mrf.mxu3  ;;  %v1690_v7 = vpop.f32.mrf.mxu1 }
  0xd1   : > { %v2027_v6 = vadd.f32 %v2026_v4, %v1857_v3  ;;  %v1691_v22 = vadd.f32 %v1690_v7, %v1521_v5  ;;  %v4489_v3 = vor.u32 %v4659_v59, %v4486_v63 }
  0xd3   : > { %v3633_v8 = vpack.c.bf16 %v2027_v6, %v1689_v2  ;;  %2696 = vmatpush.bf16.msrb.mxu3 %v4489_v3 }
  0xd5   : > { %3761 = vst [vmem:[%s5149_s19] sm:$0xff] %v3633_v8 }
  0xd7   : > { %v1859_v13 = vpop.f32.mrf.mxu2  ;;  %v1524_v18 = vpop.f32.mrf.mxu0 }
  0xd8   : > { %v2028_v17 = vpop.f32.mrf.mxu3  ;;  %v1693_v24 = vpop.f32.mrf.mxu1 }
  0xd9   : > { %v2029_v23 = vadd.f32 %v2028_v17, %v1859_v13  ;;  %v1694_v28 = vadd.f32 %v1693_v24, %v1524_v18  ;;  %v4356_v13 = vld [vmem:[#allocation6 + $0x88] sm:$0xf]  ;;  %v4629_v17 = vld [vmem:[#allocation6 + $0x94] sm:$0xf0] }
  0xda   : > { %1563 = vmatmul.bf16.gmra.mxu0 %v5154_v16  ;;  %v4357_v18 = vor.u32 %v4629_v17, %v4356_v13  ;;  %v4132_v13 = vld [vmem:[%s5028_s15 + $0xd0] sm:$0xf]  ;;  %v4573_v17 = vld [vmem:[%s5028_s15 + $0xd4] sm:$0xf0] }
  0xdb   : > { %v3635_v25 = vpack.c.bf16 %v2029_v23, %v1691_v22  ;;  %1732 = vmatmul.bf16.gmra.mxu1 %v5156_v19  ;;  %v4484_v22 = vld [vmem:[#allocation6 + $0x188] sm:$0xf]  ;;  %v4661_v23 = vld [vmem:[#allocation6 + $0x194] sm:$0xf0] }
  0xdc   : > { %1901 = vmatmul.bf16.gmra.mxu2 %v5154_v16  ;;  %2189 = vmatpush.bf16.msrb.mxu0 %v4357_v18  ;;  %v4572_v18 = vld [vmem:[%s5028_s15 + $0xd4] sm:$0xf] }
  0xdd   : > { %3763 = vst [vmem:[%s5149_s19 + $0x10] sm:$0xff] %v3635_v25  ;;  %2070 = vmatmul.bf16.gmra.mxu3 %v5156_v19  ;;  %v5182_v25 = vor.u32 %v4569_v10, %v4116_v9 }
  0xdf   : > { %v1862_v29 = vpop.f32.mrf.mxu2  ;;  %v1526_v31 = vpop.f32.mrf.mxu0 }
  0xe0   : > { %v2031_v30 = vpop.f32.mrf.mxu3  ;;  %v1695_v35 = vpop.f32.mrf.mxu1 }
  0xe1   : > { %v2032_v34 = vadd.f32 %v2031_v30, %v1862_v29  ;;  %v1696_v48 = vadd.f32 %v1695_v35, %v1526_v31  ;;  %v5184_v31 = vor.u32 %v4568_v11, %v4118_v12 }
  0xe3   : > { %v3637_v36 = vpack.c.bf16 %v2032_v34, %v1694_v28  ;;  %v4485_v28 = vor.u32 %v4661_v23, %v4484_v22  ;;  %v4134_v22 = vld [vmem:[%s5028_s15 + $0xd8] sm:$0xf0] }
  0xe5   : > { %3765 = vst [vmem:[%s5149_s19 + $0x20] sm:$0xff] %v3637_v36  ;;  %2358 = vmatpush.bf16.msrb.mxu1 %v4485_v28 }
  0xe7   : > { %v1864_v41 = vpop.f32.mrf.mxu2  ;;  %v1529_v45 = vpop.f32.mrf.mxu0 }
  0xe8   : > { %v2033_v44 = vpop.f32.mrf.mxu3  ;;  %v1698_v50 = vpop.f32.mrf.mxu1 }
  0xe9   : > { %v2034_v49 = vadd.f32 %v2033_v44, %v1864_v41  ;;  %v1699_v1 = vadd.f32 %v1698_v50, %v1529_v45  ;;  %v4571_v50 = vld [vmem:[%s5028_s15 + $0xc4] sm:$0xf0] }
  0xea   : > { %1568 = vmatmul.bf16.gmra.mxu0 %v5168_v42 }
  0xeb   : > { %v3639_v52 = vpack.c.bf16 %v2034_v49, %v1696_v48  ;;  %1737 = vmatmul.bf16.gmra.mxu1 %v5170_v46  ;;  %v4124_v49 = vld [vmem:[%s5028_s15 + $0xc0] sm:$0xf] }
  0xec   : > { %1906 = vmatmul.bf16.gmra.mxu2 %v5168_v42  ;;  %v5196_v58 = vor.u32 %v4571_v50, %v4124_v49  ;;  %v4140_v49 = vld [vmem:[%s5028_s15 + $0xe0] sm:$0xf]  ;;  %v4575_v50 = vld [vmem:[%s5028_s15 + $0xe4] sm:$0xf0] }
  0xed   : > { %3767 = vst [vmem:[%s5149_s19 + $0x30] sm:$0xff] %v3639_v52  ;;  %2075 = vmatmul.bf16.gmra.mxu3 %v5170_v46  ;;  %v4570_v52 = vld [vmem:[%s5028_s15 + $0xc4] sm:$0xf] }
  0xef   : > { %v1867_v2 = vpop.f32.mrf.mxu2  ;;  %v1531_v5 = vpop.f32.mrf.mxu0 }
  0xf0   : > { %v2036_v4 = vpop.f32.mrf.mxu3  ;;  %v1700_v7 = vpop.f32.mrf.mxu1 }
  0xf1   : > { %v2037_v6 = vadd.f32 %v2036_v4, %v1867_v2  ;;  %v1701_v34 = vadd.f32 %v1700_v7, %v1531_v5 }
  0xf3   : > { %v3641_v8 = vpack.c.bf16 %v2037_v6, %v1699_v1  ;;  %v5198_v1 = vor.u32 %v4570_v52, %v4126_v56  ;;  %v4574_v52 = vld [vmem:[%s5028_s15 + $0xe4] sm:$0xf]  ;;  %v4142_v56 = vld [vmem:[%s5028_s15 + $0xe8] sm:$0xf0] }
  0xf5   : > { %3769 = vst [vmem:[%s5149_s19 + $0x40] sm:$0xff] %v3641_v8 }
  0xf7   : > { %v1869_v24 = vpop.f32.mrf.mxu2  ;;  %v1534_v30 = vpop.f32.mrf.mxu0 }
  0xf8   : > { %v2038_v29 = vpop.f32.mrf.mxu3  ;;  %v1703_v36 = vpop.f32.mrf.mxu1 }
  0xf9   : > { %v2039_v35 = vadd.f32 %v2038_v29, %v1869_v24  ;;  %v1704_v38 = vadd.f32 %v1703_v36, %v1534_v30  ;;  %v5210_v24 = vor.u32 %v4573_v17, %v4132_v13  ;;  %v5212_v30 = vor.u32 %v4572_v18, %v4134_v22 }
  0xfa   : > { %1573 = vmatmul.bf16.gmra.mxu0 %v5182_v25 }
  0xfb   : > { %v3643_v37 = vpack.c.bf16 %v2039_v35, %v1701_v34  ;;  %1742 = vmatmul.bf16.gmra.mxu1 %v5184_v31 }
  0xfc   : > { %1911 = vmatmul.bf16.gmra.mxu2 %v5182_v25 }
  0xfd   : > { %3771 = vst [vmem:[%s5149_s19 + $0x50] sm:$0xff] %v3643_v37  ;;  %2080 = vmatmul.bf16.gmra.mxu3 %v5184_v31 }
  0xff   : > { %v1872_v39 = vpop.f32.mrf.mxu2  ;;  %v1536_v41 = vpop.f32.mrf.mxu0 }
 0x100   : > { %v2041_v40 = vpop.f32.mrf.mxu3  ;;  %v1705_v45 = vpop.f32.mrf.mxu1 }
 0x101   : > { %v2042_v44 = vadd.f32 %v2041_v40, %v1872_v39  ;;  %v1706_v2 = vadd.f32 %v1705_v45, %v1536_v41 }
 0x103   : > { %v3645_v48 = vpack.c.bf16 %v2042_v44, %v1704_v38 }
 0x105   : > { %3773 = vst [vmem:[%s5149_s19 + $0x60] sm:$0xff] %v3645_v48 }
 0x107   : > { %v1874_v57 = vpop.f32.mrf.mxu2  ;;  %v1539_v63 = vpop.f32.mrf.mxu0 }
 0x108   : > { %v2043_v59 = vpop.f32.mrf.mxu3  ;;  %v1708_v4 = vpop.f32.mrf.mxu1 }
 0x109   : > { %v2044_v3 = vadd.f32 %v2043_v59, %v1874_v57  ;;  %v1709_v6 = vadd.f32 %v1708_v4, %v1539_v63  ;;  %v5224_v59 = vor.u32 %v4575_v50, %v4140_v49 }
 0x10a   : > { %1578 = vmatmul.bf16.gmra.mxu0 %v5196_v58 }
 0x10b   : > { %v3647_v5 = vpack.c.bf16 %v2044_v3, %v1706_v2  ;;  %1747 = vmatmul.bf16.gmra.mxu1 %v5198_v1  ;;  %v5226_v3 = vor.u32 %v4574_v52, %v4142_v56 }
 0x10c   : > { %1916 = vmatmul.bf16.gmra.mxu2 %v5196_v58 }
 0x10d   : > { %3775 = vst [vmem:[%s5149_s19 + $0x70] sm:$0xff] %v3647_v5  ;;  %2085 = vmatmul.bf16.gmra.mxu3 %v5198_v1 }
 0x10f   : > { %v1877_v7 = vpop.f32.mrf.mxu2  ;;  %v1541_v9 = vpop.f32.mrf.mxu0 }
 0x110   : > { %v2046_v8 = vpop.f32.mrf.mxu3  ;;  %v1710_v11 = vpop.f32.mrf.mxu1 }
 0x111   : > { %v2047_v10 = vadd.f32 %v2046_v8, %v1877_v7  ;;  %v1711_v34 = vadd.f32 %v1710_v11, %v1541_v9  ;;  %v4623_v8 = vld [vmem:[#allocation6 + $0x6c] sm:$0xf]  ;;  %v4342_v9 = vld [vmem:[#allocation6 + $0x78] sm:$0xf0] }
 0x112   : > { %v4655_v11 = vld [vmem:[#allocation6 + $0x16c] sm:$0xf] }
 0x113   : > { %v3649_v12 = vpack.c.bf16 %v2047_v10, %v1709_v6  ;;  %v4345_v10 = vor.u32 %v4623_v8, %v4342_v9 }
 0x115   : > { %3777 = vst [vmem:[%s5149_s19 + $0x80] sm:$0xff] %v3649_v12  ;;  %v4470_v12 = vld [vmem:[#allocation6 + $0x178] sm:$0xf0]  ;;  %2528 = vmatpush.bf16.msrb.mxu2 %v4345_v10 }
 0x116   : > { %v4473_v18 = vor.u32 %v4655_v11, %v4470_v12 }
 0x117   : > { %v1879_v23 = vpop.f32.mrf.mxu2  ;;  %v1544_v29 = vpop.f32.mrf.mxu0 }
 0x118   : > { %v2048_v28 = vpop.f32.mrf.mxu3  ;;  %v1713_v36 = vpop.f32.mrf.mxu1  ;;  %2697 = vmatpush.bf16.msrb.mxu3 %v4473_v18  ;;  %v4578_v18 = vld [vmem:[%s5028_s15 + $0x104] sm:$0xf] }
 0x119   : > { %v2049_v35 = vadd.f32 %v2048_v28, %v1879_v23  ;;  %v1714_v38 = vadd.f32 %v1713_v36, %v1544_v29  ;;  %v4577_v36 = vld [vmem:[%s5028_s15 + $0xf4] sm:$0xf0] }
 0x11a   : > { %1583 = vmatmul.bf16.gmra.mxu0 %v5210_v24 }
 0x11b   : > { %v3651_v37 = vpack.c.bf16 %v2049_v35, %v1711_v34  ;;  %1752 = vmatmul.bf16.gmra.mxu1 %v5212_v30  ;;  %v4148_v35 = vld [vmem:[%s5028_s15 + $0xf0] sm:$0xf] }
 0x11c   : > { %1921 = vmatmul.bf16.gmra.mxu2 %v5210_v24  ;;  %v5238_v49 = vor.u32 %v4577_v36, %v4148_v35 }
 0x11d   : > { %3779 = vst [vmem:[%s5149_s19 + $0x90] sm:$0xff] %v3651_v37  ;;  %2090 = vmatmul.bf16.gmra.mxu3 %v5212_v30  ;;  %v4576_v37 = vld [vmem:[%s5028_s15 + $0xf4] sm:$0xf] }
 0x11f   : > { %v1882_v39 = vpop.f32.mrf.mxu2  ;;  %v1546_v41 = vpop.f32.mrf.mxu0 }
 0x120   : > { %v2051_v40 = vpop.f32.mrf.mxu3  ;;  %v1715_v45 = vpop.f32.mrf.mxu1 }
 0x121   : > { %v2052_v44 = vadd.f32 %v2051_v40, %v1882_v39  ;;  %v1716_v4 = vadd.f32 %v1715_v45, %v1546_v41  ;;  %v4340_v39 = vld [vmem:[#allocation6 + $0x68] sm:$0xf]  ;;  %v4625_v40 = vld [vmem:[#allocation6 + $0x74] sm:$0xf0] }
 0x122   : > { %v4341_v41 = vor.u32 %v4625_v40, %v4340_v39  ;;  %v4657_v45 = vld [vmem:[#allocation6 + $0x174] sm:$0xf0] }
 0x123   : > { %v3653_v48 = vpack.c.bf16 %v2052_v44, %v1714_v38  ;;  %v4150_v38 = vld [vmem:[%s5028_s15 + $0xf8] sm:$0xf0]  ;;  %v4468_v44 = vld [vmem:[#allocation6 + $0x168] sm:$0xf] }
 0x124   : > { %v4469_v50 = vor.u32 %v4657_v45, %v4468_v44  ;;  %2190 = vmatpush.bf16.msrb.mxu0 %v4341_v41 }
 0x125   : > { %3781 = vst [vmem:[%s5149_s19 + $0xa0] sm:$0xff] %v3653_v48 }
 0x126   : > { %2359 = vmatpush.bf16.msrb.mxu1 %v4469_v50 }
 0x127   : > { %v1884_v57 = vpop.f32.mrf.mxu2  ;;  %v1549_v2 = vpop.f32.mrf.mxu0 }
 0x128   : > { %v2053_v63 = vpop.f32.mrf.mxu3  ;;  %v1718_v6 = vpop.f32.mrf.mxu1 }
 0x129   : > { %v2054_v5 = vadd.f32 %v2053_v63, %v1884_v57  ;;  %v1719_v13 = vadd.f32 %v1718_v6, %v1549_v2  ;;  %v5240_v57 = vor.u32 %v4576_v37, %v4150_v38 }
 0x12a   : > { %1588 = vmatmul.bf16.gmra.mxu0 %v5224_v59 }
 0x12b   : > { %v3655_v7 = vpack.c.bf16 %v2054_v5, %v1716_v4  ;;  %1757 = vmatmul.bf16.gmra.mxu1 %v5226_v3 }
 0x12c   : > { %1926 = vmatmul.bf16.gmra.mxu2 %v5224_v59 }
 0x12d   : > { %3783 = vst [vmem:[%s5149_s19 + $0xb0] sm:$0xff] %v3655_v7  ;;  %2095 = vmatmul.bf16.gmra.mxu3 %v5226_v3 }
 0x12f   : > { %v1887_v17 = vpop.f32.mrf.mxu2  ;;  %v1551_v23 = vpop.f32.mrf.mxu0 }
 0x130   : > { %v2056_v22 = vpop.f32.mrf.mxu3  ;;  %v1720_v29 = vpop.f32.mrf.mxu1 }
 0x131   : > { %v2057_v28 = vadd.f32 %v2056_v22, %v1887_v17  ;;  %v1721_v63 = vadd.f32 %v1720_v29, %v1551_v23  ;;  %v4579_v17 = vld [vmem:[%s5028_s15 + $0x104] sm:$0xf0]  ;;  %v4158_v22 = vld [vmem:[%s5028_s15 + $0x108] sm:$0xf0] }
 0x132   : > { %v5254_v35 = vor.u32 %v4578_v18, %v4158_v22 }
 0x133   : > { %v3657_v34 = vpack.c.bf16 %v2057_v28, %v1719_v13  ;;  %v4156_v13 = vld [vmem:[%s5028_s15 + $0x100] sm:$0xf] }
 0x134   : > { %v5252_v28 = vor.u32 %v4579_v17, %v4156_v13 }
 0x135   : > { %3785 = vst [vmem:[%s5149_s19 + $0xc0] sm:$0xff] %v3657_v34 }
 0x137   : > { %v1889_v48 = vpop.f32.mrf.mxu2  ;;  %v1554_v56 = vpop.f32.mrf.mxu0 }
 0x138   : > { %v2058_v52 = vpop.f32.mrf.mxu3  ;;  %v1723_v4 = vpop.f32.mrf.mxu1 }
 0x139   : > { %v2059_v2 = vadd.f32 %v2058_v52, %v1889_v48  ;;  %v1724_v6 = vadd.f32 %v1723_v4, %v1554_v56  ;;  %v4164_v56 = vld [vmem:[%s5028_s15 + $0x110] sm:$0xf]  ;;  %v4166_v4 = vld [vmem:[%s5028_s15 + $0x118] sm:$0xf0] }
 0x13a   : > { %1593 = vmatmul.bf16.gmra.mxu0 %v5238_v49 }
 0x13b   : > { %v3659_v5 = vpack.c.bf16 %v2059_v2, %v1721_v63  ;;  %1762 = vmatmul.bf16.gmra.mxu1 %v5240_v57  ;;  %v4581_v63 = vld [vmem:[%s5028_s15 + $0x114] sm:$0xf0]  ;;  %v4580_v2 = vld [vmem:[%s5028_s15 + $0x114] sm:$0xf] }
 0x13c   : > { %1931 = vmatmul.bf16.gmra.mxu2 %v5238_v49 }
 0x13d   : > { %3787 = vst [vmem:[%s5149_s19 + $0xd0] sm:$0xff] %v3659_v5  ;;  %2100 = vmatmul.bf16.gmra.mxu3 %v5240_v57 }
 0x13f   : > { %v1892_v7 = vpop.f32.mrf.mxu2  ;;  %v1556_v9 = vpop.f32.mrf.mxu0 }
 0x140   : > { %v2061_v8 = vpop.f32.mrf.mxu3  ;;  %v1725_v11 = vpop.f32.mrf.mxu1 }
 0x141   : > { %v2062_v10 = vadd.f32 %v2061_v8, %v1892_v7  ;;  %v1726_v36 = vadd.f32 %v1725_v11, %v1556_v9  ;;  %v5268_v9 = vor.u32 %v4580_v2, %v4166_v4  ;;  %v4619_v4 = vld [vmem:[#allocation6 + $0x4c] sm:$0xf] }
 0x143   : > { %v3661_v12 = vpack.c.bf16 %v2062_v10, %v1724_v6  ;;  %v5266_v6 = vor.u32 %v4581_v63, %v4164_v56 }
 0x145   : > { %3789 = vst [vmem:[%s5149_s19 + $0xe0] sm:$0xff] %v3661_v12 }
 0x147   : > { %v1894_v23 = vpop.f32.mrf.mxu2  ;;  %v1559_v34 = vpop.f32.mrf.mxu0 }
 0x148   : > { %v2063_v29 = vpop.f32.mrf.mxu3  ;;  %v1728_v38 = vpop.f32.mrf.mxu1 }
 0x149   : > { %v2064_v37 = vadd.f32 %v2063_v29, %v1894_v23  ;;  %v1729_v40 = vadd.f32 %v1728_v38, %v1559_v34  ;;  %v4583_v38 = vld [vmem:[%s5028_s15 + $0x124] sm:$0xf0] }
 0x14a   : > { %1598 = vmatmul.bf16.gmra.mxu0 %v5252_v28 }
 0x14b   : > { %v3663_v39 = vpack.c.bf16 %v2064_v37, %v1726_v36  ;;  %1767 = vmatmul.bf16.gmra.mxu1 %v5254_v35  ;;  %v4172_v37 = vld [vmem:[%s5028_s15 + $0x120] sm:$0xf] }
 0x14c   : > { %1936 = vmatmul.bf16.gmra.mxu2 %v5252_v28 }
 0x14d   : > { %3791 = vst [vmem:[%s5149_s19 + $0xf0] sm:$0xff] %v3663_v39  ;;  %2105 = vmatmul.bf16.gmra.mxu3 %v5254_v35  ;;  %v4582_v39 = vld [vmem:[%s5028_s15 + $0x124] sm:$0xf] }
 0x14f   : > { %v1897_v41 = vpop.f32.mrf.mxu2  ;;  %v1561_v45 = vpop.f32.mrf.mxu0 }
 0x150   : > { %v2066_v44 = vpop.f32.mrf.mxu3  ;;  %v1730_v50 = vpop.f32.mrf.mxu1 }
 0x151   : > { %v2067_v48 = vadd.f32 %v2066_v44, %v1897_v41  ;;  %v1731_v10 = vadd.f32 %v1730_v50, %v1561_v45  ;;  %v5280_v44 = vor.u32 %v4583_v38, %v4172_v37  ;;  %v4584_v37 = vld [vmem:[%s5028_s15 + $0x134] sm:$0xf]  ;;  %v4182_v38 = vld [vmem:[%s5028_s15 + $0x138] sm:$0xf0] }
 0x153   : > { %v3665_v52 = vpack.c.bf16 %v2067_v48, %v1729_v40  ;;  %v4174_v40 = vld [vmem:[%s5028_s15 + $0x128] sm:$0xf0] }
 0x154   : > { %v5282_v50 = vor.u32 %v4582_v39, %v4174_v40  ;;  %v4324_v39 = vld [vmem:[#allocation6 + $0x48] sm:$0xf]  ;;  %v4621_v40 = vld [vmem:[#allocation6 + $0x54] sm:$0xf0] }
 0x155   : > { %3793 = vst [vmem:[%s5149_s19 + $0x100] sm:$0xff] %v3665_v52 }
 0x157   : > { %v1899_v5 = vpop.f32.mrf.mxu2  ;;  %v1564_v8 = vpop.f32.mrf.mxu0 }
 0x158   : > { %v2068_v7 = vpop.f32.mrf.mxu3  ;;  %v1733_v12 = vpop.f32.mrf.mxu1 }
 0x159   : > { %v2069_v11 = vadd.f32 %v2068_v7, %v1899_v5  ;;  %v1734_v17 = vadd.f32 %v1733_v12, %v1564_v8  ;;  %v4326_v5 = vld [vmem:[#allocation6 + $0x58] sm:$0xf0]  ;;  %v4651_v8 = vld [vmem:[#allocation6 + $0x14c] sm:$0xf] }
 0x15a   : > { %1603 = vmatmul.bf16.gmra.mxu0 %v5266_v6  ;;  %v4329_v7 = vor.u32 %v4619_v4, %v4326_v5  ;;  %v5296_v5 = vor.u32 %v4584_v37, %v4182_v38  ;;  %v4586_v37 = vld [vmem:[%s5028_s15 + $0x144] sm:$0xf]  ;;  %v4190_v38 = vld [vmem:[%s5028_s15 + $0x148] sm:$0xf0] }
 0x15b   : > { %v3667_v13 = vpack.c.bf16 %v2069_v11, %v1731_v10  ;;  %1772 = vmatmul.bf16.gmra.mxu1 %v5268_v9  ;;  %v4454_v10 = vld [vmem:[#allocation6 + $0x158] sm:$0xf0] }
 0x15c   : > { %1941 = vmatmul.bf16.gmra.mxu2 %v5266_v6 }
 0x15d   : > { %3795 = vst [vmem:[%s5149_s19 + $0x110] sm:$0xff] %v3667_v13  ;;  %2110 = vmatmul.bf16.gmra.mxu3 %v5268_v9  ;;  %v4457_v13 = vor.u32 %v4651_v8, %v4454_v10  ;;  %2529 = vmatpush.bf16.msrb.mxu2 %v4329_v7 }
 0x15f   : > { %v1902_v18 = vpop.f32.mrf.mxu2  ;;  %v1566_v23 = vpop.f32.mrf.mxu0  ;;  %2698 = vmatpush.bf16.msrb.mxu3 %v4457_v13 }
 0x160   : > { %v2071_v22 = vpop.f32.mrf.mxu3  ;;  %v1735_v34 = vpop.f32.mrf.mxu1 }
 0x161   : > { %v2072_v29 = vadd.f32 %v2071_v22, %v1902_v18  ;;  %v1736_v52 = vadd.f32 %v1735_v34, %v1566_v23  ;;  %v4180_v34 = vld [vmem:[%s5028_s15 + $0x130] sm:$0xf] }
 0x163   : > { %v3669_v36 = vpack.c.bf16 %v2072_v29, %v1734_v17 }
 0x165   : > { %3797 = vst [vmem:[%s5149_s19 + $0x120] sm:$0xff] %v3669_v36  ;;  %v4585_v36 = vld [vmem:[%s5028_s15 + $0x134] sm:$0xf0] }
 0x167   : > { %v1904_v41 = vpop.f32.mrf.mxu2  ;;  %v1569_v48 = vpop.f32.mrf.mxu0 }
 0x168   : > { %v2073_v45 = vpop.f32.mrf.mxu3  ;;  %v1738_v63 = vpop.f32.mrf.mxu1 }
 0x169   : > { %v2074_v56 = vadd.f32 %v2073_v45, %v1904_v41  ;;  %v1739_v11 = vadd.f32 %v1738_v63, %v1569_v48  ;;  %v4325_v41 = vor.u32 %v4621_v40, %v4324_v39  ;;  %v4452_v45 = vld [vmem:[#allocation6 + $0x148] sm:$0xf] }
 0x16a   : > { %1608 = vmatmul.bf16.gmra.mxu0 %v5280_v44 }
 0x16b   : > { %v3671_v2 = vpack.c.bf16 %v2074_v56, %v1736_v52  ;;  %1777 = vmatmul.bf16.gmra.mxu1 %v5282_v50  ;;  %v4653_v52 = vld [vmem:[#allocation6 + $0x154] sm:$0xf0]  ;;  %v5294_v56 = vor.u32 %v4585_v36, %v4180_v34  ;;  %2191 = vmatpush.bf16.msrb.mxu0 %v4325_v41  ;;  %v4188_v34 = vld [vmem:[%s5028_s15 + $0x140] sm:$0xf]  ;;  %v4587_v36 = vld [vmem:[%s5028_s15 + $0x144] sm:$0xf0] }
 0x16c   : > { %1946 = vmatmul.bf16.gmra.mxu2 %v5280_v44  ;;  %v4453_v63 = vor.u32 %v4653_v52, %v4452_v45  ;;  %v5308_v40 = vor.u32 %v4587_v36, %v4188_v34  ;;  %v5310_v52 = vor.u32 %v4586_v37, %v4190_v38 }
 0x16d   : > { %3799 = vst [vmem:[%s5149_s19 + $0x130] sm:$0xff] %v3671_v2  ;;  %2115 = vmatmul.bf16.gmra.mxu3 %v5282_v50 }
 0x16e   : > { %2360 = vmatpush.bf16.msrb.mxu1 %v4453_v63 }
 0x16f   : > { %v1907_v12 = vpop.f32.mrf.mxu2  ;;  %v1571_v18 = vpop.f32.mrf.mxu0 }
 0x170   : > { %v2076_v17 = vpop.f32.mrf.mxu3  ;;  %v1740_v23 = vpop.f32.mrf.mxu1 }
 0x171   : > { %v2077_v22 = vadd.f32 %v2076_v17, %v1907_v12  ;;  %v1741_v7 = vadd.f32 %v1740_v23, %v1571_v18 }
 0x173   : > { %v3673_v29 = vpack.c.bf16 %v2077_v22, %v1739_v11 }
 0x175   : > { %3801 = vst [vmem:[%s5149_s19 + $0x140] sm:$0xff] %v3673_v29 }
 0x177   : > { %v1909_v48 = vpop.f32.mrf.mxu2  ;;  %v1574_v4 = vpop.f32.mrf.mxu0 }
 0x178   : > { %v2078_v2 = vpop.f32.mrf.mxu3  ;;  %v1743_v10 = vpop.f32.mrf.mxu1 }
 0x179   : > { %v2079_v8 = vadd.f32 %v2078_v2, %v1909_v48  ;;  %v1744_v12 = vadd.f32 %v1743_v10, %v1574_v4 }
 0x17a   : > { %1613 = vmatmul.bf16.gmra.mxu0 %v5294_v56 }
 0x17b   : > { %v3675_v11 = vpack.c.bf16 %v2079_v8, %v1741_v7  ;;  %1782 = vmatmul.bf16.gmra.mxu1 %v5296_v5 }
 0x17c   : > { %1951 = vmatmul.bf16.gmra.mxu2 %v5294_v56 }
 0x17d   : > { %3803 = vst [vmem:[%s5149_s19 + $0x150] sm:$0xff] %v3675_v11  ;;  %2120 = vmatmul.bf16.gmra.mxu3 %v5296_v5 }
 0x17f   : > { %v1912_v13 = vpop.f32.mrf.mxu2  ;;  %v1576_v18 = vpop.f32.mrf.mxu0 }
 0x180   : > { %v2081_v17 = vpop.f32.mrf.mxu3  ;;  %v1745_v23 = vpop.f32.mrf.mxu1 }
 0x181   : > { %v2082_v22 = vadd.f32 %v2081_v17, %v1912_v13  ;;  %v1746_v48 = vadd.f32 %v1745_v23, %v1576_v18  ;;  %v4196_v18 = vld [vmem:[%s5028_s15 + $0x150] sm:$0xf]  ;;  %v4588_v23 = vld [vmem:[%s5028_s15 + $0x154] sm:$0xf] }
 0x183   : > { %v3677_v29 = vpack.c.bf16 %v2082_v22, %v1744_v12  ;;  %v4589_v22 = vld [vmem:[%s5028_s15 + $0x154] sm:$0xf0] }
 0x184   : > { %v5322_v36 = vor.u32 %v4589_v22, %v4196_v18  ;;  %v4590_v18 = vld [vmem:[%s5028_s15 + $0x164] sm:$0xf]  ;;  %v4206_v22 = vld [vmem:[%s5028_s15 + $0x168] sm:$0xf0] }
 0x185   : > { %3805 = vst [vmem:[%s5149_s19 + $0x160] sm:$0xff] %v3677_v29  ;;  %v4198_v29 = vld [vmem:[%s5028_s15 + $0x158] sm:$0xf0] }
 0x186   : > { %5764 = vst [vmem:[#allocation12_spill] sm:$0xff] %v5322_v36 }
 0x187   : > { %v1914_v39 = vpop.f32.mrf.mxu2  ;;  %v1579_v45 = vpop.f32.mrf.mxu0 }
 0x188   : > { %v2083_v41 = vpop.f32.mrf.mxu3  ;;  %v1748_v2 = vpop.f32.mrf.mxu1 }
 0x189   : > { %v2084_v63 = vadd.f32 %v2083_v41, %v1914_v39  ;;  %v1749_v7 = vadd.f32 %v1748_v2, %v1579_v45  ;;  %v5324_v39 = vor.u32 %v4588_v23, %v4198_v29 }
 0x18a   : > { %1618 = vmatmul.bf16.gmra.mxu0 %v5308_v40 }
 0x18b   : > { %v3679_v4 = vpack.c.bf16 %v2084_v63, %v1746_v48  ;;  %1787 = vmatmul.bf16.gmra.mxu1 %v5310_v52  ;;  %5765 = vst [vmem:[#allocation13_spill] sm:$0xff] %v5324_v39 }
 0x18c   : > { %1956 = vmatmul.bf16.gmra.mxu2 %v5308_v40 }
 0x18d   : > { %3807 = vst [vmem:[%s5149_s19 + $0x170] sm:$0xff] %v3679_v4  ;;  %2125 = vmatmul.bf16.gmra.mxu3 %v5310_v52 }
 0x18f   : > { %v1917_v8 = vpop.f32.mrf.mxu2  ;;  %v1581_v11 = vpop.f32.mrf.mxu0 }
 0x190   : > { %v2086_v10 = vpop.f32.mrf.mxu3  ;;  %v1750_v13 = vpop.f32.mrf.mxu1 }
 0x191   : > { %v2087_v12 = vadd.f32 %v2086_v10, %v1917_v8  ;;  %v1751_v41 = vadd.f32 %v1750_v13, %v1581_v11  ;;  %v4204_v13 = vld [vmem:[%s5028_s15 + $0x160] sm:$0xf] }
 0x193   : > { %v3681_v17 = vpack.c.bf16 %v2087_v12, %v1749_v7 }
 0x195   : > { %3809 = vst [vmem:[%s5149_s19 + $0x180] sm:$0xff] %v3681_v17  ;;  %v4591_v17 = vld [vmem:[%s5028_s15 + $0x164] sm:$0xf0] }
 0x196   : > { %v5336_v29 = vor.u32 %v4591_v17, %v4204_v13 }
 0x197   : > { %v1919_v34 = vpop.f32.mrf.mxu2  ;;  %v1584_v38 = vpop.f32.mrf.mxu0 }
 0x198   : > { %v2088_v37 = vpop.f32.mrf.mxu3  ;;  %v1753_v48 = vpop.f32.mrf.mxu1  ;;  %5766 = vst [vmem:[#allocation14_spill] sm:$0xff] %v5336_v29 }
 0x199   : > { %v2089_v45 = vadd.f32 %v2088_v37, %v1919_v34  ;;  %v1754_v2 = vadd.f32 %v1753_v48, %v1584_v38 }
 0x19a   : > { %1623 = vmatmul.bf16.gmra.mxu0 %v5322_v36 }
 0x19b   : > { %v3683_v63 = vpack.c.bf16 %v2089_v45, %v1751_v41  ;;  %1792 = vmatmul.bf16.gmra.mxu1 %v5324_v39  ;;  %v5338_v41 = vor.u32 %v4590_v18, %v4206_v22 }
 0x19c   : > { %1961 = vmatmul.bf16.gmra.mxu2 %v5322_v36  ;;  %v4649_v36 = vld [vmem:[#allocation6 + $0x134] sm:$0xf0] }
 0x19d   : > { %3811 = vst [vmem:[%s5149_s19 + $0x190] sm:$0xff] %v3683_v63  ;;  %2130 = vmatmul.bf16.gmra.mxu3 %v5324_v39  ;;  %v4436_v39 = vld [vmem:[#allocation6 + $0x128] sm:$0xf] }
 0x19e   : > { %5767 = vst [vmem:[#allocation15_spill] sm:$0xff] %v5338_v41 }
 0x19f   : > { %v1922_v4 = vpop.f32.mrf.mxu2  ;;  %v1586_v8 = vpop.f32.mrf.mxu0 }
 0x1a0   : > { %v2091_v7 = vpop.f32.mrf.mxu3  ;;  %v1755_v11 = vpop.f32.mrf.mxu1 }
 0x1a1   : > { %v2092_v10 = vadd.f32 %v2091_v7, %v1922_v4  ;;  %v1756_v38 = vadd.f32 %v1755_v11, %v1586_v8  ;;  %v4310_v4 = vld [vmem:[#allocation6 + $0x38] sm:$0xf0]  ;;  %v4647_v8 = vld [vmem:[#allocation6 + $0x12c] sm:$0xf] }
 0x1a3   : > { %v3685_v12 = vpack.c.bf16 %v2092_v10, %v1754_v2  ;;  %v4615_v2 = vld [vmem:[#allocation6 + $0x2c] sm:$0xf]  ;;  %v4438_v10 = vld [vmem:[#allocation6 + $0x138] sm:$0xf0] }
 0x1a4   : > { %v4313_v7 = vor.u32 %v4615_v2, %v4310_v4  ;;  %v4441_v13 = vor.u32 %v4647_v8, %v4438_v10  ;;  %v4308_v2 = vld [vmem:[#allocation6 + $0x28] sm:$0xf]  ;;  %v4617_v4 = vld [vmem:[#allocation6 + $0x34] sm:$0xf0]  ;;  %v4437_v8 = vor.u32 %v4649_v36, %v4436_v39 }
 0x1a5   : > { %3813 = vst [vmem:[%s5149_s19 + $0x1a0] sm:$0xff] %v3685_v12 }
 0x1a6   : > { %2530 = vmatpush.bf16.msrb.mxu2 %v4313_v7  ;;  %2699 = vmatpush.bf16.msrb.mxu3 %v4441_v13 }
 0x1a7   : > { %v1924_v23 = vpop.f32.mrf.mxu2  ;;  %v1589_v37 = vpop.f32.mrf.mxu0  ;;  %2361 = vmatpush.bf16.msrb.mxu1 %v4437_v8 }
 0x1a8   : > { %v2093_v34 = vpop.f32.mrf.mxu3  ;;  %v1758_v48 = vpop.f32.mrf.mxu1 }
 0x1a9   : > { %v2094_v45 = vadd.f32 %v2093_v34, %v1924_v23  ;;  %v1759_v11 = vadd.f32 %v1758_v48, %v1589_v37 }
 0x1aa   : > { %1628 = vmatmul.bf16.gmra.mxu0 %v5336_v29 }
 0x1ab   : > { %v3687_v63 = vpack.c.bf16 %v2094_v45, %v1756_v38  ;;  %1797 = vmatmul.bf16.gmra.mxu1 %v5338_v41  ;;  %v4212_v38 = vld [vmem:[%s5028_s15 + $0x170] sm:$0xf]  ;;  %v4593_v45 = vld [vmem:[%s5028_s15 + $0x174] sm:$0xf0] }
 0x1ac   : > { %1966 = vmatmul.bf16.gmra.mxu2 %v5336_v29  ;;  %v4309_v29 = vor.u32 %v4617_v4, %v4308_v2  ;;  %v5350_v48 = vor.u32 %v4593_v45, %v4212_v38  ;;  %v4220_v38 = vld [vmem:[%s5028_s15 + $0x180] sm:$0xf]  ;;  %v4595_v45 = vld [vmem:[%s5028_s15 + $0x184] sm:$0xf0]  ;;  %v4222_v2 = vld [vmem:[%s5028_s15 + $0x188] sm:$0xf0] }
 0x1ad   : > { %3815 = vst [vmem:[%s5149_s19 + $0x1b0] sm:$0xff] %v3687_v63  ;;  %2135 = vmatmul.bf16.gmra.mxu3 %v5338_v41  ;;  %v4592_v63 = vld [vmem:[%s5028_s15 + $0x174] sm:$0xf]  ;;  %v4214_v41 = vld [vmem:[%s5028_s15 + $0x178] sm:$0xf0] }
 0x1ae   : > { %5768 = vst [vmem:[#allocation16_spill] sm:$0xff] %v5350_v48  ;;  %2192 = vmatpush.bf16.msrb.mxu0 %v4309_v29 }
 0x1af   : > { %v1927_v12 = vpop.f32.mrf.mxu2  ;;  %v1591_v18 = vpop.f32.mrf.mxu0 }
 0x1b0   : > { %v2096_v17 = vpop.f32.mrf.mxu3  ;;  %v1760_v23 = vpop.f32.mrf.mxu1 }
 0x1b1   : > { %v2097_v22 = vadd.f32 %v2096_v17, %v1927_v12  ;;  %v5352_v12 = vor.u32 %v4592_v63, %v4214_v41  ;;  %v4594_v63 = vld [vmem:[%s5028_s15 + $0x184] sm:$0xf] }
 0x1b3   : > { %v3689_v34 = vpack.c.bf16 %v2097_v22, %v1759_v11  ;;  %5769 = vst [vmem:[#allocation17_spill] sm:$0xff] %v5352_v12  ;;  %v1761_v11 = vadd.f32 %v1760_v23, %v1591_v18 }
 0x1b5   : > { %3817 = vst [vmem:[%s5149_s19 + $0x1c0] sm:$0xff] %v3689_v34 }
 0x1b7   : > { %v1929_v37 = vpop.f32.mrf.mxu2  ;;  %v1594_v10 = vpop.f32.mrf.mxu0 }
 0x1b8   : > { %v2098_v7 = vpop.f32.mrf.mxu3  ;;  %v1763_v17 = vpop.f32.mrf.mxu1 }
 0x1b9   : > { %v2099_v13 = vadd.f32 %v2098_v7, %v1929_v37  ;;  %v1764_v36 = vadd.f32 %v1763_v17, %v1594_v10  ;;  %v5364_v37 = vor.u32 %v4595_v45, %v4220_v38  ;;  %v4228_v38 = vld [vmem:[%s5028_s15 + $0x190] sm:$0xf]  ;;  %v4597_v45 = vld [vmem:[%s5028_s15 + $0x194] sm:$0xf0] }
 0x1ba   : > { %1633 = vmatmul.bf16.gmra.mxu0 %v5350_v48 }
 0x1bb   : > { %v3691_v22 = vpack.c.bf16 %v2099_v13, %v1761_v11  ;;  %1802 = vmatmul.bf16.gmra.mxu1 %v5352_v12  ;;  %5770 = vst [vmem:[#allocation18_spill] sm:$0xff] %v5364_v37  ;;  %v5366_v11 = vor.u32 %v4594_v63, %v4222_v2  ;;  %v4596_v63 = vld [vmem:[%s5028_s15 + $0x194] sm:$0xf]  ;;  %v4230_v2 = vld [vmem:[%s5028_s15 + $0x198] sm:$0xf0] }
 0x1bc   : > { %1971 = vmatmul.bf16.gmra.mxu2 %v5350_v48  ;;  %v4645_v48 = vld [vmem:[#allocation6 + $0x114] sm:$0xf0] }
 0x1bd   : > { %3819 = vst [vmem:[%s5149_s19 + $0x1d0] sm:$0xff] %v3691_v22  ;;  %2140 = vmatmul.bf16.gmra.mxu3 %v5352_v12  ;;  %v4420_v12 = vld [vmem:[#allocation6 + $0x108] sm:$0xf] }
 0x1be   : > { %5771 = vst [vmem:[#allocation19_spill] sm:$0xff] %v5366_v11 }
 0x1bf   : > { %v1932_v39 = vpop.f32.mrf.mxu2  ;;  %v1596_v41 = vpop.f32.mrf.mxu0 }
 0x1c0   : > { %v2101_v29 = vpop.f32.mrf.mxu3  ;;  %v1765_v23 = vpop.f32.mrf.mxu1 }
 0x1c1   : > { %v2102_v18 = vadd.f32 %v2101_v29, %v1932_v39  ;;  %v1766_v10 = vadd.f32 %v1765_v23, %v1596_v41 }
 0x1c3   : > { %v3693_v34 = vpack.c.bf16 %v2102_v18, %v1764_v36 }
 0x1c5   : > { %3821 = vst [vmem:[%s5149_s19 + $0x1e0] sm:$0xff] %v3693_v34 }
 0x1c7   : > { %v1934_v4 = vpop.f32.mrf.mxu2  ;;  %v1599_v7 = vpop.f32.mrf.mxu0 }
 0x1c8   : > { %v2103_v8 = vpop.f32.mrf.mxu3  ;;  %v1768_v17 = vpop.f32.mrf.mxu1 }
 0x1c9   : > { %v2104_v13 = vadd.f32 %v2103_v8, %v1934_v4  ;;  %v1769_v36 = vadd.f32 %v1768_v17, %v1599_v7  ;;  %v5378_v8 = vor.u32 %v4597_v45, %v4228_v38 }
 0x1ca   : > { %1638 = vmatmul.bf16.gmra.mxu0 %v5364_v37 }
 0x1cb   : > { %v3695_v22 = vpack.c.bf16 %v2104_v13, %v1766_v10  ;;  %1807 = vmatmul.bf16.gmra.mxu1 %v5366_v11  ;;  %5772 = vst [vmem:[#allocation20_spill] sm:$0xff] %v5378_v8 }
 0x1cc   : > { %1976 = vmatmul.bf16.gmra.mxu2 %v5364_v37 }
 0x1cd   : > { %3823 = vst [vmem:[%s5149_s19 + $0x1f0] sm:$0xff] %v3695_v22  ;;  %2145 = vmatmul.bf16.gmra.mxu3 %v5366_v11  ;;  %v5380_v22 = vor.u32 %v4596_v63, %v4230_v2  ;;  %v4236_v63 = vld [vmem:[%s5028_s15 + $0x1a0] sm:$0xf]  ;;  %v4599_v2 = vld [vmem:[%s5028_s15 + $0x1a4] sm:$0xf0] }
 0x1cf   : > { %v1937_v39 = vpop.f32.mrf.mxu2  ;;  %v1601_v41 = vpop.f32.mrf.mxu0  ;;  %5773 = vst [vmem:[#allocation21_spill] sm:$0xff] %v5380_v22 }
 0x1d0   : > { %v2106_v29 = vpop.f32.mrf.mxu3  ;;  %v1770_v23 = vpop.f32.mrf.mxu1 }
 0x1d1   : > { %v2107_v18 = vadd.f32 %v2106_v29, %v1937_v39  ;;  %v1771_v7 = vadd.f32 %v1770_v23, %v1601_v41 }
 0x1d3   : > { %v3697_v34 = vpack.c.bf16 %v2107_v18, %v1769_v36 }
 0x1d5   : > { %3825 = vst [vmem:[%s5149_s19 + $0x200] sm:$0xff] %v3697_v34 }
 0x1d7   : > { %v1939_v4 = vpop.f32.mrf.mxu2  ;;  %v1604_v13 = vpop.f32.mrf.mxu0 }
 0x1d8   : > { %v2108_v10 = vpop.f32.mrf.mxu3  ;;  %v1773_v39 = vpop.f32.mrf.mxu1 }
 0x1d9   : > { %v2109_v17 = vadd.f32 %v2108_v10, %v1939_v4  ;;  %v1774_v29 = vadd.f32 %v1773_v39, %v1604_v13  ;;  %v4598_v4 = vld [vmem:[%s5028_s15 + $0x1a4] sm:$0xf]  ;;  %v4238_v10 = vld [vmem:[%s5028_s15 + $0x1a8] sm:$0xf0] }
 0x1da   : > { %1643 = vmatmul.bf16.gmra.mxu0 %v5378_v8  ;;  %v5394_v11 = vor.u32 %v4598_v4, %v4238_v10 }
 0x1db   : > { %v3699_v36 = vpack.c.bf16 %v2109_v17, %v1771_v7  ;;  %1812 = vmatmul.bf16.gmra.mxu1 %v5380_v22  ;;  %v5392_v17 = vor.u32 %v4599_v2, %v4236_v63 }
 0x1dc   : > { %1981 = vmatmul.bf16.gmra.mxu2 %v5378_v8  ;;  %5775 = vst [vmem:[#allocation23_spill] sm:$0xff] %v5394_v11 }
 0x1dd   : > { %3827 = vst [vmem:[%s5149_s19 + $0x210] sm:$0xff] %v3699_v36  ;;  %2150 = vmatmul.bf16.gmra.mxu3 %v5380_v22 }
 0x1de   : > { %5774 = vst [vmem:[#allocation22_spill] sm:$0xff] %v5392_v17 }
 0x1df   : > { %v1942_v18 = vpop.f32.mrf.mxu2  ;;  %v1606_v23 = vpop.f32.mrf.mxu0 }
 0x1e0   : > { %v2111_v41 = vpop.f32.mrf.mxu3  ;;  %v1775_v38 = vpop.f32.mrf.mxu1 }
 0x1e1   : > { %v2112_v34 = vadd.f32 %v2111_v41, %v1942_v18  ;;  %v1776_v13 = vadd.f32 %v1775_v38, %v1606_v23  ;;  %v4294_v18 = vld [vmem:[#allocation6 + $0x18] sm:$0xf0]  ;;  %v4643_v23 = vld [vmem:[#allocation6 + $0x10c] sm:$0xf] }
 0x1e3   : > { %v3701_v45 = vpack.c.bf16 %v2112_v34, %v1774_v29  ;;  %v4611_v29 = vld [vmem:[#allocation6 + $0xc] sm:$0xf] }
 0x1e4   : > { %v4297_v41 = vor.u32 %v4611_v29, %v4294_v18  ;;  %v4292_v29 = vld [vmem:[#allocation6 + $0x8] sm:$0xf]  ;;  %v4613_v18 = vld [vmem:[#allocation6 + $0x14] sm:$0xf0] }
 0x1e5   : > { %3829 = vst [vmem:[%s5149_s19 + $0x220] sm:$0xff] %v3701_v45 }
 0x1e6   : > { %2531 = vmatpush.bf16.msrb.mxu2 %v4297_v41 }
 0x1e7   : > { %v1944_v7 = vpop.f32.mrf.mxu2  ;;  %v1609_v36 = vpop.f32.mrf.mxu0 }
 0x1e8   : > { %v2113_v8 = vpop.f32.mrf.mxu3  ;;  %v1778_v22 = vpop.f32.mrf.mxu1 }
 0x1e9   : > { %v2114_v39 = vadd.f32 %v2113_v8, %v1944_v7  ;;  %v4422_v8 = vld [vmem:[#allocation6 + $0x118] sm:$0xf0]  ;;  %v1779_v34 = vadd.f32 %v1778_v22, %v1609_v36  ;;  %v4244_v7 = vld [vmem:[%s5028_s15 + $0x1b0] sm:$0xf] }
 0x1ea   : > { %1648 = vmatmul.bf16.gmra.mxu0 %v5392_v17  ;;  %v4425_v45 = vor.u32 %v4643_v23, %v4422_v8  ;;  %v4421_v23 = vor.u32 %v4645_v48, %v4420_v12 }
 0x1eb   : > { %v3703_v37 = vpack.c.bf16 %v2114_v39, %v1776_v13  ;;  %1817 = vmatmul.bf16.gmra.mxu1 %v5394_v11  ;;  %v4601_v13 = vld [vmem:[%s5028_s15 + $0x1b4] sm:$0xf0]  ;;  %v4600_v39 = vld [vmem:[%s5028_s15 + $0x1b4] sm:$0xf] }
 0x1ec   : > { %1986 = vmatmul.bf16.gmra.mxu2 %v5392_v17  ;;  %2700 = vmatpush.bf16.msrb.mxu3 %v4425_v45  ;;  %v4293_v17 = vor.u32 %v4613_v18, %v4292_v29  ;;  %v5406_v36 = vor.u32 %v4601_v13, %v4244_v7  ;;  %v4252_v7 = vld [vmem:[%s5028_s15 + $0x1c0] sm:$0xf]  ;;  %v4603_v13 = vld [vmem:[%s5028_s15 + $0x1c4] sm:$0xf0]  ;;  %v4254_v29 = vld [vmem:[%s5028_s15 + $0x1c8] sm:$0xf0] }
 0x1ed   : > { %3831 = vst [vmem:[%s5149_s19 + $0x230] sm:$0xff] %v3703_v37  ;;  %2155 = vmatmul.bf16.gmra.mxu3 %v5394_v11  ;;  %v4246_v11 = vld [vmem:[%s5028_s15 + $0x1b8] sm:$0xf0]  ;;  %2362 = vmatpush.bf16.msrb.mxu1 %v4421_v23 }
 0x1ee   : > { %2193 = vmatpush.bf16.msrb.mxu0 %v4293_v17 }
 0x1ef   : > { %v1947_v38 = vpop.f32.mrf.mxu2  ;;  %v1611_v2 = vpop.f32.mrf.mxu0 }
 0x1f0   : > { %v2116_v63 = vpop.f32.mrf.mxu3  ;;  %v1780_v37 = vpop.f32.mrf.mxu1 }
 0x1f1   : > { %v2117_v4 = vadd.f32 %v2116_v63, %v1947_v38  ;;  %v5408_v38 = vor.u32 %v4600_v39, %v4246_v11  ;;  %v4602_v39 = vld [vmem:[%s5028_s15 + $0x1c4] sm:$0xf] }
 0x1f3   : > { %v3705_v10 = vpack.c.bf16 %v2117_v4, %v1779_v34  ;;  %v1781_v34 = vadd.f32 %v1780_v37, %v1611_v2 }
 0x1f5   : > { %3833 = vst [vmem:[%s5149_s19 + $0x240] sm:$0xff] %v3705_v10 }
 0x1f7   : > { %v1949_v22 = vpop.f32.mrf.mxu2  ;;  %v1614_v8 = vpop.f32.mrf.mxu0 }
 0x1f8   : > { %v2118_v41 = vpop.f32.mrf.mxu3  ;;  %v1783_v63 = vpop.f32.mrf.mxu1 }
 0x1f9   : > { %v2119_v45 = vadd.f32 %v2118_v41, %v1949_v22  ;;  %v1784_v48 = vadd.f32 %v1783_v63, %v1614_v8  ;;  %v5420_v22 = vor.u32 %v4603_v13, %v4252_v7  ;;  %v4260_v7 = vld [vmem:[%s5028_s15 + $0x1d0] sm:$0xf]  ;;  %v4605_v13 = vld [vmem:[%s5028_s15 + $0x1d4] sm:$0xf0] }
 0x1fa   : > { %1653 = vmatmul.bf16.gmra.mxu0 %v5406_v36 }
 0x1fb   : > { %v3707_v4 = vpack.c.bf16 %v2119_v45, %v1781_v34  ;;  %1822 = vmatmul.bf16.gmra.mxu1 %v5408_v38  ;;  %v5422_v34 = vor.u32 %v4602_v39, %v4254_v29  ;;  %v4604_v39 = vld [vmem:[%s5028_s15 + $0x1d4] sm:$0xf]  ;;  %v4262_v29 = vld [vmem:[%s5028_s15 + $0x1d8] sm:$0xf0] }
 0x1fc   : > { %1991 = vmatmul.bf16.gmra.mxu2 %v5406_v36 }
 0x1fd   : > { %3835 = vst [vmem:[%s5149_s19 + $0x250] sm:$0xff] %v3707_v4  ;;  %2160 = vmatmul.bf16.gmra.mxu3 %v5408_v38 }
 0x1fe   : > { %5776 = vst [vmem:[#allocation24_spill] sm:$0xff] %v5422_v34 }
 0x1ff   : > { %v1952_v12 = vpop.f32.mrf.mxu2  ;;  %v1616_v17 = vpop.f32.mrf.mxu0 }
 0x200   : > { %v2121_v11 = vpop.f32.mrf.mxu3  ;;  %v1785_v37 = vpop.f32.mrf.mxu1 }
 0x201   : > { %v2122_v2 = vadd.f32 %v2121_v11, %v1952_v12  ;;  %v1786_v8 = vadd.f32 %v1785_v37, %v1616_v17 }
 0x203   : > { %v3709_v10 = vpack.c.bf16 %v2122_v2, %v1784_v48 }
 0x205   : > { %3837 = vst [vmem:[%s5149_s19 + $0x260] sm:$0xff] %v3709_v10 }
 0x207   : > { %v1954_v18 = vpop.f32.mrf.mxu2  ;;  %v1619_v41 = vpop.f32.mrf.mxu0 }
 0x208   : > { %v2123_v23 = vpop.f32.mrf.mxu3  ;;  %v1788_v63 = vpop.f32.mrf.mxu1 }
 0x209   : > { %v2124_v45 = vadd.f32 %v2123_v23, %v1954_v18  ;;  %v1789_v48 = vadd.f32 %v1788_v63, %v1619_v41  ;;  %v5434_v23 = vor.u32 %v4605_v13, %v4260_v7 }
 0x20a   : > { %1658 = vmatmul.bf16.gmra.mxu0 %v5420_v22 }
 0x20b   : > { %v3711_v4 = vpack.c.bf16 %v2124_v45, %v1786_v8  ;;  %1827 = vmatmul.bf16.gmra.mxu1 %v5422_v34  ;;  %5777 = vst [vmem:[#allocation25_spill] sm:$0xff] %v5434_v23 }
 0x20c   : > { %1996 = vmatmul.bf16.gmra.mxu2 %v5420_v22 }
 0x20d   : > { %3839 = vst [vmem:[%s5149_s19 + $0x270] sm:$0xff] %v3711_v4  ;;  %2165 = vmatmul.bf16.gmra.mxu3 %v5422_v34  ;;  %v5436_v4 = vor.u32 %v4604_v39, %v4262_v29  ;;  %v4268_v39 = vld [vmem:[%s5028_s15 + $0x1e0] sm:$0xf]  ;;  %v4607_v29 = vld [vmem:[%s5028_s15 + $0x1e4] sm:$0xf0] }
 0x20f   : > { %v1957_v12 = vpop.f32.mrf.mxu2  ;;  %v1621_v17 = vpop.f32.mrf.mxu0  ;;  %5778 = vst [vmem:[#allocation26_spill] sm:$0xff] %v5436_v4 }
 0x210   : > { %v2126_v11 = vpop.f32.mrf.mxu3  ;;  %v1790_v37 = vpop.f32.mrf.mxu1 }
 0x211   : > { %v2127_v2 = vadd.f32 %v2126_v11, %v1957_v12  ;;  %v1791_v41 = vadd.f32 %v1790_v37, %v1621_v17 }
 0x213   : > { %v3713_v10 = vpack.c.bf16 %v2127_v2, %v1789_v48 }
 0x215   : > { %3841 = vst [vmem:[%s5149_s19 + $0x280] sm:$0xff] %v3713_v10 }
 0x217   : > { %v1959_v18 = vpop.f32.mrf.mxu2  ;;  %v1624_v45 = vpop.f32.mrf.mxu0 }
 0x218   : > { %v2128_v8 = vpop.f32.mrf.mxu3  ;;  %v1793_v12 = vpop.f32.mrf.mxu1 }
 0x219   : > { %v2129_v63 = vadd.f32 %v2128_v8, %v1959_v18  ;;  %v1794_v11 = vadd.f32 %v1793_v12, %v1624_v45  ;;  %v4606_v18 = vld [vmem:[%s5028_s15 + $0x1e4] sm:$0xf]  ;;  %v4270_v8 = vld [vmem:[%s5028_s15 + $0x1e8] sm:$0xf0] }
 0x21a   : > { %1663 = vmatmul.bf16.gmra.mxu0 %v5434_v23  ;;  %v5450_v34 = vor.u32 %v4606_v18, %v4270_v8  ;;  %v4609_v18 = vld [vmem:[%s5028_s15 + $0x1f4] sm:$0xf0]  ;;  %v4608_v8 = vld [vmem:[%s5028_s15 + $0x1f4] sm:$0xf] }
 0x21b   : > { %v3715_v48 = vpack.c.bf16 %v2129_v63, %v1791_v41  ;;  %1832 = vmatmul.bf16.gmra.mxu1 %v5436_v4  ;;  %v5448_v63 = vor.u32 %v4607_v29, %v4268_v39  ;;  %v4276_v29 = vld [vmem:[%s5028_s15 + $0x1f0] sm:$0xf] }
 0x21c   : > { %2001 = vmatmul.bf16.gmra.mxu2 %v5434_v23  ;;  %5780 = vst [vmem:[#allocation28_spill] sm:$0xff] %v5450_v34 }
 0x21d   : > { %3843 = vst [vmem:[%s5149_s19 + $0x290] sm:$0xff] %v3715_v48  ;;  %2170 = vmatmul.bf16.gmra.mxu3 %v5436_v4 }
 0x21e   : > { %5779 = vst [vmem:[#allocation27_spill] sm:$0xff] %v5448_v63 }
 0x21f   : > { %v1962_v2 = vpop.f32.mrf.mxu2  ;;  %v1626_v37 = vpop.f32.mrf.mxu0 }
 0x220   : > { %v2131_v17 = vpop.f32.mrf.mxu3  ;;  %v1795_v7 = vpop.f32.mrf.mxu1 }
 0x221   : > { %v2132_v10 = vadd.f32 %v2131_v17, %v1962_v2  ;;  %v1796_v45 = vadd.f32 %v1795_v7, %v1626_v37 }
 0x223   : > { %v3717_v13 = vpack.c.bf16 %v2132_v10, %v1794_v11 }
 0x225   : > { %3845 = vst [vmem:[%s5149_s19 + $0x2a0] sm:$0xff] %v3717_v13 }
 0x227   : > { %v1964_v41 = vpop.f32.mrf.mxu2  ;;  %v1629_v48 = vpop.f32.mrf.mxu0 }
 0x228   : > { %v2133_v23 = vpop.f32.mrf.mxu3  ;;  %v1798_v2 = vpop.f32.mrf.mxu1 }
 0x229   : > { %v2134_v12 = vadd.f32 %v2133_v23, %v1964_v41  ;;  %v1799_v17 = vadd.f32 %v1798_v2, %v1629_v48  ;;  %v4278_v41 = vld [vmem:[%s5028_s15 + $0x1f8] sm:$0xf0] }
 0x22a   : > { %1668 = vmatmul.bf16.gmra.mxu0 %v5448_v63  ;;  %v5464_v4 = vor.u32 %v4608_v8, %v4278_v41 }
 0x22b   : > { %v3719_v11 = vpack.c.bf16 %v2134_v12, %v1796_v45  ;;  %1837 = vmatmul.bf16.gmra.mxu1 %v5450_v34  ;;  %v5462_v12 = vor.u32 %v4609_v18, %v4276_v29 }
 0x22c   : > { %2006 = vmatmul.bf16.gmra.mxu2 %v5448_v63 }
 0x22d   : > { %3847 = vst [vmem:[%s5149_s19 + $0x2b0] sm:$0xff] %v3719_v11  ;;  %2175 = vmatmul.bf16.gmra.mxu3 %v5450_v34 }
 0x22f   : > { %v1967_v10 = vpop.f32.mrf.mxu2  ;;  %v1631_v7 = vpop.f32.mrf.mxu0 }
 0x230   : > { %v2136_v37 = vpop.f32.mrf.mxu3  ;;  %v1800_v13 = vpop.f32.mrf.mxu1 }
 0x231   : > { %v2137_v23 = vadd.f32 %v2136_v37, %v1967_v10  ;;  %v1801_v48 = vadd.f32 %v1800_v13, %v1631_v7 }
 0x233   : > { %v3721_v39 = vpack.c.bf16 %v2137_v23, %v1799_v17 }
 0x235   : > { %3849 = vst [vmem:[%s5149_s19 + $0x2c0] sm:$0xff] %v3721_v39 }
 0x237   : > { %v1969_v45 = vpop.f32.mrf.mxu2  ;;  %v1634_v11 = vpop.f32.mrf.mxu0 }
 0x238   : > { %v2138_v63 = vpop.f32.mrf.mxu3  ;;  %v1803_v34 = vpop.f32.mrf.mxu1 }
 0x239   : > { %v2139_v2 = vadd.f32 %v2138_v63, %v1969_v45  ;;  %v1804_v17 = vadd.f32 %v1803_v34, %v1634_v11 }
 0x23a   : > { %1673 = vmatmul.bf16.gmra.mxu0 %v5462_v12 }
 0x23b   : > { %v3723_v10 = vpack.c.bf16 %v2139_v2, %v1801_v48  ;;  %1842 = vmatmul.bf16.gmra.mxu1 %v5464_v4 }
 0x23c   : > { %2011 = vmatmul.bf16.gmra.mxu2 %v5462_v12 }
 0x23d   : > { %3851 = vst [vmem:[%s5149_s19 + $0x2d0] sm:$0xff] %v3723_v10  ;;  %2180 = vmatmul.bf16.gmra.mxu3 %v5464_v4 }
 0x23f   : > { %v1972_v37 = vpop.f32.mrf.mxu2  ;;  %v1636_v39 = vpop.f32.mrf.mxu0 }
 0x240   : > { %v2141_v23 = vpop.f32.mrf.mxu3  ;;  %v1805_v7 = vpop.f32.mrf.mxu1 }
 0x241   : > { %v2142_v29 = vadd.f32 %v2141_v23, %v1972_v37  ;;  %v1806_v41 = vadd.f32 %v1805_v7, %v1636_v39 }
 0x243   : > { %v3725_v13 = vpack.c.bf16 %v2142_v29, %v1804_v17 }
 0x245   : > { %3853 = vst [vmem:[%s5149_s19 + $0x2e0] sm:$0xff] %v3725_v13 }
 0x247   : > { %v1974_v63 = vpop.f32.mrf.mxu2  ;;  %v1639_v8 = vpop.f32.mrf.mxu0 }
 0x248   : > { %v2143_v18 = vpop.f32.mrf.mxu3  ;;  %v1808_v48 = vpop.f32.mrf.mxu1 }
 0x249   : > { %v2144_v45 = vadd.f32 %v2143_v18, %v1974_v63  ;;  %v1809_v34 = vadd.f32 %v1808_v48, %v1639_v8 }
 0x24a   : > { %2194 = vmatmul.bf16.vlgmr.msrb.gmra.mxu0 %v5042_v43 }
 0x24b   : > { %v3727_v2 = vpack.c.bf16 %v2144_v45, %v1806_v41  ;;  %2363 = vmatmul.bf16.vlgmr.msrb.gmra.mxu1 %v5044_v47 }
 0x24c   : > { %2532 = vmatmul.bf16.vlgmr.msrb.gmra.mxu2 %v5042_v43 }
 0x24d   : > { %3855 = vst [vmem:[%s5149_s19 + $0x2f0] sm:$0xff] %v3727_v2  ;;  %2701 = vmatmul.bf16.vlgmr.msrb.gmra.mxu3 %v5044_v47 }
 0x24f   : > { %v1977_v11 = vpop.f32.mrf.mxu2  ;;  %v1641_v17 = vpop.f32.mrf.mxu0 }
 0x250   : > { %v2146_v10 = vpop.f32.mrf.mxu3  ;;  %v1810_v23 = vpop.f32.mrf.mxu1 }
 0x251   : > { %v2147_v37 = vadd.f32 %v2146_v10, %v1977_v11  ;;  %v1811_v63 = vadd.f32 %v1810_v23, %v1641_v17 }
 0x253   : > { %v3729_v39 = vpack.c.bf16 %v2147_v37, %v1809_v34 }
 0x255   : > { %3857 = vst [vmem:[%s5149_s19 + $0x300] sm:$0xff] %v3729_v39 }
 0x257   : > { %v1979_v29 = vpop.f32.mrf.mxu2  ;;  %v1644_v13 = vpop.f32.mrf.mxu0 }
 0x258   : > { %v2148_v7 = vpop.f32.mrf.mxu3  ;;  %v1813_v41 = vpop.f32.mrf.mxu1 }
 0x259   : > { %v2149_v18 = vadd.f32 %v2148_v7, %v1979_v29  ;;  %v1814_v47 = vadd.f32 %v1813_v41, %v1644_v13 }
 0x25a   : > { %2199 = vmatmul.bf16.gmra.mxu0 %v5054_v54 }
 0x25b   : > { %v3731_v43 = vpack.c.bf16 %v2149_v18, %v1811_v63  ;;  %2368 = vmatmul.bf16.gmra.mxu1 %v5056_v55 }
 0x25c   : > { %2537 = vmatmul.bf16.gmra.mxu2 %v5054_v54 }
 0x25d   : > { %3859 = vst [vmem:[%s5149_s19 + $0x310] sm:$0xff] %v3731_v43  ;;  %2706 = vmatmul.bf16.gmra.mxu3 %v5056_v55 }
 0x25f   : > { %v1982_v8 = vpop.f32.mrf.mxu2  ;;  %v1646_v48 = vpop.f32.mrf.mxu0 }
 0x260   : > { %v2151_v45 = vpop.f32.mrf.mxu3  ;;  %v1815_v34 = vpop.f32.mrf.mxu1 }
 0x261   : > { %v2152_v2 = vadd.f32 %v2151_v45, %v1982_v8  ;;  %v1816_v23 = vadd.f32 %v1815_v34, %v1646_v48 }
 0x263   : > { %v3733_v11 = vpack.c.bf16 %v2152_v2, %v1814_v47 }
 0x265   : > { %3861 = vst [vmem:[%s5149_s19 + $0x320] sm:$0xff] %v3733_v11 }
 0x267   : > { %v1984_v10 = vpop.f32.mrf.mxu2  ;;  %v1649_v37 = vpop.f32.mrf.mxu0 }
 0x268   : > { %v2153_v17 = vpop.f32.mrf.mxu3  ;;  %v1818_v29 = vpop.f32.mrf.mxu1 }
 0x269   : > { %v2154_v39 = vadd.f32 %v2153_v17, %v1984_v10  ;;  %v1819_v55 = vadd.f32 %v1818_v29, %v1649_v37 }
 0x26a   : > { %2204 = vmatmul.bf16.gmra.mxu0 %v5066_v60 }
 0x26b   : > { %v3735_v54 = vpack.c.bf16 %v2154_v39, %v1816_v23  ;;  %2373 = vmatmul.bf16.gmra.mxu1 %v5068_v61 }
 0x26c   : > { %2542 = vmatmul.bf16.gmra.mxu2 %v5066_v60 }
 0x26d   : > { %3863 = vst [vmem:[%s5149_s19 + $0x330] sm:$0xff] %v3735_v54  ;;  %2711 = vmatmul.bf16.gmra.mxu3 %v5068_v61 }
 0x26f   : > { %v1987_v7 = vpop.f32.mrf.mxu2  ;;  %v1651_v63 = vpop.f32.mrf.mxu0 }
 0x270   : > { %v2156_v13 = vpop.f32.mrf.mxu3  ;;  %v1820_v41 = vpop.f32.mrf.mxu1 }
 0x271   : > { %v2157_v18 = vadd.f32 %v2156_v13, %v1987_v7  ;;  %v1821_v48 = vadd.f32 %v1820_v41, %v1651_v63 }
 0x273   : > { %v3737_v43 = vpack.c.bf16 %v2157_v18, %v1819_v55 }
 0x275   : > { %3865 = vst [vmem:[%s5149_s19 + $0x340] sm:$0xff] %v3737_v43 }
 0x277   : > { %v1989_v47 = vpop.f32.mrf.mxu2  ;;  %v1654_v45 = vpop.f32.mrf.mxu0 }
 0x278   : > { %v2158_v8 = vpop.f32.mrf.mxu3  ;;  %v1823_v34 = vpop.f32.mrf.mxu1 }
 0x279   : > { %v2159_v2 = vadd.f32 %v2158_v8, %v1989_v47  ;;  %v1824_v61 = vadd.f32 %v1823_v34, %v1654_v45 }
 0x27a   : > { %2209 = vmatmul.bf16.gmra.mxu0 %v5078_v14 }
 0x27b   : > { %v3739_v60 = vpack.c.bf16 %v2159_v2, %v1821_v48  ;;  %2378 = vmatmul.bf16.gmra.mxu1 %v5080_v15 }
 0x27c   : > { %2547 = vmatmul.bf16.gmra.mxu2 %v5078_v14 }
 0x27d   : > { %3867 = vst [vmem:[%s5149_s19 + $0x350] sm:$0xff] %v3739_v60  ;;  %2716 = vmatmul.bf16.gmra.mxu3 %v5080_v15 }
 0x27f   : > { %v1992_v11 = vpop.f32.mrf.mxu2  ;;  %v1656_v17 = vpop.f32.mrf.mxu0 }
 0x280   : > { %v2161_v10 = vpop.f32.mrf.mxu3  ;;  %v1825_v23 = vpop.f32.mrf.mxu1 }
 0x281   : > { %v2162_v37 = vadd.f32 %v2161_v10, %v1992_v11  ;;  %v1826_v7 = vadd.f32 %v1825_v23, %v1656_v17 }
 0x283   : > { %v3741_v39 = vpack.c.bf16 %v2162_v37, %v1824_v61 }
 0x285   : > { %3869 = vst [vmem:[%s5149_s19 + $0x360] sm:$0xff] %v3741_v39 }
 0x287   : > { %v1994_v29 = vpop.f32.mrf.mxu2  ;;  %v1659_v55 = vpop.f32.mrf.mxu0 }
 0x288   : > { %v2163_v54 = vpop.f32.mrf.mxu3  ;;  %v1828_v63 = vpop.f32.mrf.mxu1 }
 0x289   : > { %v2164_v13 = vadd.f32 %v2163_v54, %v1994_v29  ;;  %v1829_v15 = vadd.f32 %v1828_v63, %v1659_v55 }
 0x28a   : > { %2214 = vmatmul.bf16.gmra.mxu0 %v5090_v20 }
 0x28b   : > { %v3743_v14 = vpack.c.bf16 %v2164_v13, %v1826_v7  ;;  %2383 = vmatmul.bf16.gmra.mxu1 %v5092_v21 }
 0x28c   : > { %2552 = vmatmul.bf16.gmra.mxu2 %v5090_v20 }
 0x28d   : > { %3871 = vst [vmem:[%s5149_s19 + $0x370] sm:$0xff] %v3743_v14  ;;  %2721 = vmatmul.bf16.gmra.mxu3 %v5092_v21 }
 0x28f   : > { %v1997_v18 = vpop.f32.mrf.mxu2  ;;  %v1661_v43 = vpop.f32.mrf.mxu0 }
 0x290   : > { %v2166_v41 = vpop.f32.mrf.mxu3  ;;  %v1830_v8 = vpop.f32.mrf.mxu1 }
 0x291   : > { %v2167_v47 = vadd.f32 %v2166_v41, %v1997_v18  ;;  %v1831_v60 = vadd.f32 %v1830_v8, %v1661_v43 }
 0x293   : > { %v3745_v45 = vpack.c.bf16 %v2167_v47, %v1829_v15 }
 0x295   : > { %3873 = vst [vmem:[%s5149_s19 + $0x380] sm:$0xff] %v3745_v45 }
 0x297   : > { %v1999_v48 = vpop.f32.mrf.mxu2  ;;  %v1664_v34 = vpop.f32.mrf.mxu0 }
 0x298   : > { %v2168_v2 = vpop.f32.mrf.mxu3  ;;  %v1833_v11 = vpop.f32.mrf.mxu1 }
 0x299   : > { %v2169_v61 = vadd.f32 %v2168_v2, %v1999_v48  ;;  %v1834_v21 = vadd.f32 %v1833_v11, %v1664_v34 }
 0x29a   : > { %2219 = vmatmul.bf16.gmra.mxu0 %v5102_v26 }
 0x29b   : > { %v3747_v20 = vpack.c.bf16 %v2169_v61, %v1831_v60  ;;  %2388 = vmatmul.bf16.gmra.mxu1 %v5104_v27 }
 0x29c   : > { %2557 = vmatmul.bf16.gmra.mxu2 %v5102_v26 }
 0x29d   : > { %3875 = vst [vmem:[%s5149_s19 + $0x390] sm:$0xff] %v3747_v20  ;;  %2726 = vmatmul.bf16.gmra.mxu3 %v5104_v27 }
 0x29f   : > { %v2002_v10 = vpop.f32.mrf.mxu2  ;;  %v1666_v37 = vpop.f32.mrf.mxu0 }
 0x2a0   : > { %v2171_v17 = vpop.f32.mrf.mxu3  ;;  %v1835_v39 = vpop.f32.mrf.mxu1 }
 0x2a1   : > { %v2172_v23 = vadd.f32 %v2171_v17, %v2002_v10  ;;  %v1836_v13 = vadd.f32 %v1835_v39, %v1666_v37 }
 0x2a3   : > { %v3749_v29 = vpack.c.bf16 %v2172_v23, %v1834_v21 }
 0x2a5   : > { %3877 = vst [vmem:[%s5149_s19 + $0x3a0] sm:$0xff] %v3749_v29 }
 0x2a7   : > { %v2004_v54 = vpop.f32.mrf.mxu2  ;;  %v1669_v7 = vpop.f32.mrf.mxu0 }
 0x2a8   : > { %v2173_v55 = vpop.f32.mrf.mxu3  ;;  %v1838_v14 = vpop.f32.mrf.mxu1 }
 0x2a9   : > { %v2174_v63 = vadd.f32 %v2173_v55, %v2004_v54  ;;  %v1839_v27 = vadd.f32 %v1838_v14, %v1669_v7 }
 0x2aa   : > { %2224 = vmatmul.bf16.gmra.mxu0 %v5114_v32 }
 0x2ab   : > { %v3751_v26 = vpack.c.bf16 %v2174_v63, %v1836_v13  ;;  %2393 = vmatmul.bf16.gmra.mxu1 %v5116_v33 }
 0x2ac   : > { %2562 = vmatmul.bf16.gmra.mxu2 %v5114_v32 }
 0x2ad   : > { %3879 = vst [vmem:[%s5149_s19 + $0x3b0] sm:$0xff] %v3751_v26  ;;  %2731 = vmatmul.bf16.gmra.mxu3 %v5116_v33 }
 0x2af   : > { %v2007_v15 = vpop.f32.mrf.mxu2  ;;  %v1671_v41 = vpop.f32.mrf.mxu0 }
 0x2b0   : > { %v2176_v18 = vpop.f32.mrf.mxu3  ;;  %v1840_v47 = vpop.f32.mrf.mxu1 }
 0x2b1   : > { %v2177_v43 = vadd.f32 %v2176_v18, %v2007_v15  ;;  %v1841_v34 = vadd.f32 %v1840_v47, %v1671_v41 }
 0x2b3   : > { %v3753_v8 = vpack.c.bf16 %v2177_v43, %v1839_v27 }
 0x2b5   : > { %3881 = vst [vmem:[%s5149_s19 + $0x3c0] sm:$0xff] %v3753_v8 }
 0x2b7   : > { %v2009_v45 = vpop.f32.mrf.mxu2  ;;  %v1674_v2 = vpop.f32.mrf.mxu0 }
 0x2b8   : > { %v2178_v48 = vpop.f32.mrf.mxu3  ;;  %v1843_v61 = vpop.f32.mrf.mxu1 }
 0x2b9   : > { %v2179_v60 = vadd.f32 %v2178_v48, %v2009_v45  ;;  %v1844_v33 = vadd.f32 %v1843_v61, %v1674_v2 }
 0x2ba   : > { %2229 = vmatmul.bf16.gmra.mxu0 %v5126_v51 }
 0x2bb   : > { %v3755_v32 = vpack.c.bf16 %v2179_v60, %v1841_v34  ;;  %2398 = vmatmul.bf16.gmra.mxu1 %v5128_v53 }
 0x2bc   : > { %2567 = vmatmul.bf16.gmra.mxu2 %v5126_v51 }
 0x2bd   : > { %3883 = vst [vmem:[%s5149_s19 + $0x3d0] sm:$0xff] %v3755_v32  ;;  %2736 = vmatmul.bf16.gmra.mxu3 %v5128_v53 }
 0x2bf   : > { %v2012_v11 = vpop.f32.mrf.mxu2  ;;  %v1676_v21 = vpop.f32.mrf.mxu0 }
 0x2c0   : > { %v2181_v20 = vpop.f32.mrf.mxu3  ;;  %v1845_v17 = vpop.f32.mrf.mxu1 }
 0x2c1   : > { %v2182_v10 = vadd.f32 %v2181_v20, %v2012_v11  ;;  %v1846_v54 = vadd.f32 %v1845_v17, %v1676_v21 }
 0x2c3   : > { %v3757_v37 = vpack.c.bf16 %v2182_v10, %v1844_v33 }
 0x2c5   : > { %3885 = vst [vmem:[%s5149_s19 + $0x3e0] sm:$0xff] %v3757_v37 }
 0x2c7   : > { %v2014_v23 = vpop.f32.mrf.mxu2  ;;  %v2195_v29 = vpop.f32.mrf.mxu0 }
 0x2c8   : > { %v2183_v39 = vpop.f32.mrf.mxu3  ;;  %v2364_v7 = vpop.f32.mrf.mxu1 }
 0x2c9   : > { %v2184_v55 = vadd.f32 %v2183_v39, %v2014_v23  ;;  %v2365_v53 = vadd.f32 %v2364_v7, %v2195_v29 }
 0x2ca   : > { %2234 = vmatmul.bf16.gmra.mxu0 %v5138_v62 }
 0x2cb   : > { %v3759_v51 = vpack.c.bf16 %v2184_v55, %v1846_v54  ;;  %2403 = vmatmul.bf16.gmra.mxu1 %v5140_v0 }
 0x2cc   : > { %2572 = vmatmul.bf16.gmra.mxu2 %v5138_v62 }
 0x2cd   : > { %3887 = vst [vmem:[%s5149_s19 + $0x3f0] sm:$0xff] %v3759_v51  ;;  %2741 = vmatmul.bf16.gmra.mxu3 %v5140_v0 }
 0x2cf   : > { %v2533_v13 = vpop.f32.mrf.mxu2  ;;  %v2197_v14 = vpop.f32.mrf.mxu0 }
 0x2d0   : > { %v2702_v63 = vpop.f32.mrf.mxu3  ;;  %v2366_v27 = vpop.f32.mrf.mxu1 }
 0x2d1   : > { %v2703_v26 = vadd.f32 %v2702_v63, %v2533_v13  ;;  %v2367_v47 = vadd.f32 %v2366_v27, %v2197_v14 }
 0x2d3   : > { %v3634_v15 = vpack.c.bf16 %v2703_v26, %v2365_v53 }
 0x2d5   : > { %3762 = vst [vmem:[%s5149_s19 + $0x8] sm:$0xff] %v3634_v15 }
 0x2d7   : > { %v2535_v18 = vpop.f32.mrf.mxu2  ;;  %v2200_v43 = vpop.f32.mrf.mxu0 }
 0x2d8   : > { %v2704_v41 = vpop.f32.mrf.mxu3  ;;  %v2369_v45 = vpop.f32.mrf.mxu1 }
 0x2d9   : > { %v2705_v8 = vadd.f32 %v2704_v41, %v2535_v18  ;;  %v2370_v0 = vadd.f32 %v2369_v45, %v2200_v43 }
 0x2da   : > { %2239 = vmatmul.bf16.gmra.mxu0 %v5154_v16 }
 0x2db   : > { %v3636_v62 = vpack.c.bf16 %v2705_v8, %v2367_v47  ;;  %2408 = vmatmul.bf16.gmra.mxu1 %v5156_v19 }
 0x2dc   : > { %2577 = vmatmul.bf16.gmra.mxu2 %v5154_v16 }
 0x2dd   : > { %3764 = vst [vmem:[%s5149_s19 + $0x18] sm:$0xff] %v3636_v62  ;;  %2746 = vmatmul.bf16.gmra.mxu3 %v5156_v19 }
 0x2df   : > { %v2538_v48 = vpop.f32.mrf.mxu2  ;;  %v2202_v34 = vpop.f32.mrf.mxu0 }
 0x2e0   : > { %v2707_v2 = vpop.f32.mrf.mxu3  ;;  %v2371_v61 = vpop.f32.mrf.mxu1 }
 0x2e1   : > { %v2708_v60 = vadd.f32 %v2707_v2, %v2538_v48  ;;  %v2372_v21 = vadd.f32 %v2371_v61, %v2202_v34 }
 0x2e3   : > { %v3638_v32 = vpack.c.bf16 %v2708_v60, %v2370_v0 }
 0x2e5   : > { %3766 = vst [vmem:[%s5149_s19 + $0x28] sm:$0xff] %v3638_v32 }
 0x2e7   : > { %v2540_v33 = vpop.f32.mrf.mxu2  ;;  %v2205_v20 = vpop.f32.mrf.mxu0 }
 0x2e8   : > { %v2709_v11 = vpop.f32.mrf.mxu3  ;;  %v2374_v17 = vpop.f32.mrf.mxu1 }
 0x2e9   : > { %v2710_v10 = vadd.f32 %v2709_v11, %v2540_v33  ;;  %v2375_v19 = vadd.f32 %v2374_v17, %v2205_v20 }
 0x2ea   : > { %2244 = vmatmul.bf16.gmra.mxu0 %v5168_v42 }
 0x2eb   : > { %v3640_v16 = vpack.c.bf16 %v2710_v10, %v2372_v21  ;;  %2413 = vmatmul.bf16.gmra.mxu1 %v5170_v46 }
 0x2ec   : > { %2582 = vmatmul.bf16.gmra.mxu2 %v5168_v42 }
 0x2ed   : > { %3768 = vst [vmem:[%s5149_s19 + $0x38] sm:$0xff] %v3640_v16  ;;  %2751 = vmatmul.bf16.gmra.mxu3 %v5170_v46 }
 0x2ef   : > { %v2543_v37 = vpop.f32.mrf.mxu2  ;;  %v2207_v39 = vpop.f32.mrf.mxu0 }
 0x2f0   : > { %v2712_v23 = vpop.f32.mrf.mxu3  ;;  %v2376_v54 = vpop.f32.mrf.mxu1 }
 0x2f1   : > { %v2713_v29 = vadd.f32 %v2712_v23, %v2543_v37  ;;  %v2377_v13 = vadd.f32 %v2376_v54, %v2207_v39 }
 0x2f3   : > { %v3642_v55 = vpack.c.bf16 %v2713_v29, %v2375_v19 }
 0x2f5   : > { %3770 = vst [vmem:[%s5149_s19 + $0x48] sm:$0xff] %v3642_v55 }
 0x2f7   : > { %v2545_v7 = vpop.f32.mrf.mxu2  ;;  %v2210_v53 = vpop.f32.mrf.mxu0 }
 0x2f8   : > { %v2714_v51 = vpop.f32.mrf.mxu3  ;;  %v2379_v14 = vpop.f32.mrf.mxu1 }
 0x2f9   : > { %v2715_v63 = vadd.f32 %v2714_v51, %v2545_v7  ;;  %v2380_v46 = vadd.f32 %v2379_v14, %v2210_v53 }
 0x2fa   : > { %2249 = vmatmul.bf16.gmra.mxu0 %v5182_v25 }
 0x2fb   : > { %v3644_v42 = vpack.c.bf16 %v2715_v63, %v2377_v13  ;;  %2418 = vmatmul.bf16.gmra.mxu1 %v5184_v31 }
 0x2fc   : > { %2587 = vmatmul.bf16.gmra.mxu2 %v5182_v25 }
 0x2fd   : > { %3772 = vst [vmem:[%s5149_s19 + $0x58] sm:$0xff] %v3644_v42  ;;  %2756 = vmatmul.bf16.gmra.mxu3 %v5184_v31 }
 0x2ff   : > { %v2548_v26 = vpop.f32.mrf.mxu2  ;;  %v2212_v15 = vpop.f32.mrf.mxu0 }
 0x300   : > { %v2717_v27 = vpop.f32.mrf.mxu3  ;;  %v2381_v41 = vpop.f32.mrf.mxu1 }
 0x301   : > { %v2718_v18 = vadd.f32 %v2717_v27, %v2548_v26  ;;  %v2382_v62 = vadd.f32 %v2381_v41, %v2212_v15 }
 0x303   : > { %v3646_v43 = vpack.c.bf16 %v2718_v18, %v2380_v46 }
 0x305   : > { %3774 = vst [vmem:[%s5149_s19 + $0x68] sm:$0xff] %v3646_v43 }
 0x307   : > { %v2550_v47 = vpop.f32.mrf.mxu2  ;;  %v2215_v45 = vpop.f32.mrf.mxu0 }
 0x308   : > { %v2719_v8 = vpop.f32.mrf.mxu3  ;;  %v2384_v48 = vpop.f32.mrf.mxu1 }
 0x309   : > { %v2720_v0 = vadd.f32 %v2719_v8, %v2550_v47  ;;  %v2385_v31 = vadd.f32 %v2384_v48, %v2215_v45 }
 0x30a   : > { %2254 = vmatmul.bf16.gmra.mxu0 %v5196_v58 }
 0x30b   : > { %v3648_v25 = vpack.c.bf16 %v2720_v0, %v2382_v62  ;;  %2423 = vmatmul.bf16.gmra.mxu1 %v5198_v1 }
 0x30c   : > { %2592 = vmatmul.bf16.gmra.mxu2 %v5196_v58 }
 0x30d   : > { %3776 = vst [vmem:[%s5149_s19 + $0x78] sm:$0xff] %v3648_v25  ;;  %2761 = vmatmul.bf16.gmra.mxu3 %v5198_v1 }
 0x30f   : > { %v2553_v2 = vpop.f32.mrf.mxu2  ;;  %v2217_v60 = vpop.f32.mrf.mxu0 }
 0x310   : > { %v2722_v34 = vpop.f32.mrf.mxu3  ;;  %v2386_v32 = vpop.f32.mrf.mxu1 }
 0x311   : > { %v2723_v61 = vadd.f32 %v2722_v34, %v2553_v2  ;;  %v2387_v10 = vadd.f32 %v2386_v32, %v2217_v60 }
 0x313   : > { %v3650_v33 = vpack.c.bf16 %v2723_v61, %v2385_v31 }
 0x315   : > { %3778 = vst [vmem:[%s5149_s19 + $0x88] sm:$0xff] %v3650_v33 }
 0x317   : > { %v2555_v11 = vpop.f32.mrf.mxu2  ;;  %v2220_v21 = vpop.f32.mrf.mxu0 }
 0x318   : > { %v2724_v20 = vpop.f32.mrf.mxu3  ;;  %v2389_v16 = vpop.f32.mrf.mxu1 }
 0x319   : > { %v2725_v17 = vadd.f32 %v2724_v20, %v2555_v11  ;;  %v2390_v1 = vadd.f32 %v2389_v16, %v2220_v21 }
 0x31a   : > { %2259 = vmatmul.bf16.gmra.mxu0 %v5210_v24 }
 0x31b   : > { %v3652_v58 = vpack.c.bf16 %v2725_v17, %v2387_v10  ;;  %2428 = vmatmul.bf16.gmra.mxu1 %v5212_v30 }
 0x31c   : > { %2597 = vmatmul.bf16.gmra.mxu2 %v5210_v24 }
 0x31d   : > { %3780 = vst [vmem:[%s5149_s19 + $0x98] sm:$0xff] %v3652_v58  ;;  %2766 = vmatmul.bf16.gmra.mxu3 %v5212_v30 }
 0x31f   : > { %v2558_v19 = vpop.f32.mrf.mxu2  ;;  %v2222_v23 = vpop.f32.mrf.mxu0 }
 0x320   : > { %v2727_v37 = vpop.f32.mrf.mxu3  ;;  %v2391_v29 = vpop.f32.mrf.mxu1 }
 0x321   : > { %v2728_v39 = vadd.f32 %v2727_v37, %v2558_v19  ;;  %v2392_v53 = vadd.f32 %v2391_v29, %v2222_v23 }
 0x323   : > { %v3654_v54 = vpack.c.bf16 %v2728_v39, %v2390_v1 }
 0x325   : > { %3782 = vst [vmem:[%s5149_s19 + $0xa8] sm:$0xff] %v3654_v54 }
 0x327   : > { %v2560_v55 = vpop.f32.mrf.mxu2  ;;  %v2225_v51 = vpop.f32.mrf.mxu0 }
 0x328   : > { %v2729_v7 = vpop.f32.mrf.mxu3  ;;  %v2394_v63 = vpop.f32.mrf.mxu1 }
 0x329   : > { %v2730_v13 = vadd.f32 %v2729_v7, %v2560_v55  ;;  %v2395_v30 = vadd.f32 %v2394_v63, %v2225_v51 }
 0x32a   : > { %2264 = vmatmul.bf16.gmra.mxu0 %v5224_v59 }
 0x32b   : > { %v3656_v24 = vpack.c.bf16 %v2730_v13, %v2392_v53  ;;  %2433 = vmatmul.bf16.gmra.mxu1 %v5226_v3 }
 0x32c   : > { %2602 = vmatmul.bf16.gmra.mxu2 %v5224_v59 }
 0x32d   : > { %3784 = vst [vmem:[%s5149_s19 + $0xb8] sm:$0xff] %v3656_v24  ;;  %2771 = vmatmul.bf16.gmra.mxu3 %v5226_v3 }
 0x32f   : > { %v2563_v14 = vpop.f32.mrf.mxu2  ;;  %v2227_v46 = vpop.f32.mrf.mxu0 }
 0x330   : > { %v2732_v42 = vpop.f32.mrf.mxu3  ;;  %v2396_v27 = vpop.f32.mrf.mxu1 }
 0x331   : > { %v2733_v26 = vadd.f32 %v2732_v42, %v2563_v14  ;;  %v2397_v47 = vadd.f32 %v2396_v27, %v2227_v46 }
 0x333   : > { %v3658_v15 = vpack.c.bf16 %v2733_v26, %v2395_v30 }
 0x335   : > { %3786 = vst [vmem:[%s5149_s19 + $0xc8] sm:$0xff] %v3658_v15 }
 0x337   : > { %v2565_v18 = vpop.f32.mrf.mxu2  ;;  %v2230_v43 = vpop.f32.mrf.mxu0 }
 0x338   : > { %v2734_v41 = vpop.f32.mrf.mxu3  ;;  %v2399_v45 = vpop.f32.mrf.mxu1 }
 0x339   : > { %v2735_v8 = vadd.f32 %v2734_v41, %v2565_v18  ;;  %v2400_v3 = vadd.f32 %v2399_v45, %v2230_v43 }
 0x33a   : > { %2269 = vmatmul.bf16.gmra.mxu0 %v5238_v49 }
 0x33b   : > { %v3660_v59 = vpack.c.bf16 %v2735_v8, %v2397_v47  ;;  %2438 = vmatmul.bf16.gmra.mxu1 %v5240_v57 }
 0x33c   : > { %2607 = vmatmul.bf16.gmra.mxu2 %v5238_v49 }
 0x33d   : > { %3788 = vst [vmem:[%s5149_s19 + $0xd8] sm:$0xff] %v3660_v59  ;;  %2776 = vmatmul.bf16.gmra.mxu3 %v5240_v57 }
 0x33f   : > { %v2568_v62 = vpop.f32.mrf.mxu2  ;;  %v2232_v48 = vpop.f32.mrf.mxu0 }
 0x340   : > { %v2737_v0 = vpop.f32.mrf.mxu3  ;;  %v2401_v31 = vpop.f32.mrf.mxu1 }
 0x341   : > { %v2738_v25 = vadd.f32 %v2737_v0, %v2568_v62  ;;  %v2402_v32 = vadd.f32 %v2401_v31, %v2232_v48 }
 0x343   : > { %v3662_v2 = vpack.c.bf16 %v2738_v25, %v2400_v3 }
 0x345   : > { %3790 = vst [vmem:[%s5149_s19 + $0xe8] sm:$0xff] %v3662_v2 }
 0x347   : > { %v2570_v34 = vpop.f32.mrf.mxu2  ;;  %v2235_v61 = vpop.f32.mrf.mxu0 }
 0x348   : > { %v2739_v60 = vpop.f32.mrf.mxu3  ;;  %v2404_v11 = vpop.f32.mrf.mxu1 }
 0x349   : > { %v2740_v33 = vadd.f32 %v2739_v60, %v2570_v34  ;;  %v2405_v57 = vadd.f32 %v2404_v11, %v2235_v61 }
 0x34a   : > { %2274 = vmatmul.bf16.gmra.mxu0 %v5252_v28 }
 0x34b   : > { %v3664_v49 = vpack.c.bf16 %v2740_v33, %v2402_v32  ;;  %2443 = vmatmul.bf16.gmra.mxu1 %v5254_v35 }
 0x34c   : > { %2612 = vmatmul.bf16.gmra.mxu2 %v5252_v28 }
 0x34d   : > { %3792 = vst [vmem:[%s5149_s19 + $0xf8] sm:$0xff] %v3664_v49  ;;  %2781 = vmatmul.bf16.gmra.mxu3 %v5254_v35 }
 0x34f   : > { %v2573_v20 = vpop.f32.mrf.mxu2  ;;  %v2237_v10 = vpop.f32.mrf.mxu0 }
 0x350   : > { %v2742_v21 = vpop.f32.mrf.mxu3  ;;  %v2406_v16 = vpop.f32.mrf.mxu1 }
 0x351   : > { %v2743_v17 = vadd.f32 %v2742_v21, %v2573_v20  ;;  %v2407_v23 = vadd.f32 %v2406_v16, %v2237_v10 }
 0x353   : > { %v3666_v58 = vpack.c.bf16 %v2743_v17, %v2405_v57 }
 0x355   : > { %3794 = vst [vmem:[%s5149_s19 + $0x108] sm:$0xff] %v3666_v58 }
 0x357   : > { %v2575_v1 = vpop.f32.mrf.mxu2  ;;  %v2240_v37 = vpop.f32.mrf.mxu0 }
 0x358   : > { %v2744_v19 = vpop.f32.mrf.mxu3  ;;  %v2409_v29 = vpop.f32.mrf.mxu1 }
 0x359   : > { %v2745_v39 = vadd.f32 %v2744_v19, %v2575_v1  ;;  %v2410_v35 = vadd.f32 %v2409_v29, %v2240_v37  ;;  %v5781_v29 = vld [vmem:[#allocation12_spill] sm:$0xff] }
 0x35a   : > { %2279 = vmatmul.bf16.gmra.mxu0 %v5266_v6 }
 0x35b   : > { %v3668_v28 = vpack.c.bf16 %v2745_v39, %v2407_v23  ;;  %2448 = vmatmul.bf16.gmra.mxu1 %v5268_v9 }
 0x35c   : > { %2617 = vmatmul.bf16.gmra.mxu2 %v5266_v6 }
 0x35d   : > { %3796 = vst [vmem:[%s5149_s19 + $0x118] sm:$0xff] %v3668_v28  ;;  %2786 = vmatmul.bf16.gmra.mxu3 %v5268_v9 }
 0x35f   : > { %v2578_v54 = vpop.f32.mrf.mxu2  ;;  %v2242_v7 = vpop.f32.mrf.mxu0 }
 0x360   : > { %v2747_v55 = vpop.f32.mrf.mxu3  ;;  %v2411_v53 = vpop.f32.mrf.mxu1 }
 0x361   : > { %v2748_v51 = vadd.f32 %v2747_v55, %v2578_v54  ;;  %v2412_v14 = vadd.f32 %v2411_v53, %v2242_v7 }
 0x363   : > { %v3670_v13 = vpack.c.bf16 %v2748_v51, %v2410_v35 }
 0x365   : > { %3798 = vst [vmem:[%s5149_s19 + $0x128] sm:$0xff] %v3670_v13 }
 0x367   : > { %v2580_v63 = vpop.f32.mrf.mxu2  ;;  %v2245_v30 = vpop.f32.mrf.mxu0 }
 0x368   : > { %v2749_v24 = vpop.f32.mrf.mxu3  ;;  %v2414_v46 = vpop.f32.mrf.mxu1 }
 0x369   : > { %v2750_v42 = vadd.f32 %v2749_v24, %v2580_v63  ;;  %v2415_v9 = vadd.f32 %v2414_v46, %v2245_v30 }
 0x36a   : > { %2284 = vmatmul.bf16.gmra.mxu0 %v5280_v44 }
 0x36b   : > { %v3672_v6 = vpack.c.bf16 %v2750_v42, %v2412_v14  ;;  %2453 = vmatmul.bf16.gmra.mxu1 %v5282_v50 }
 0x36c   : > { %2622 = vmatmul.bf16.gmra.mxu2 %v5280_v44 }
 0x36d   : > { %3800 = vst [vmem:[%s5149_s19 + $0x138] sm:$0xff] %v3672_v6  ;;  %2791 = vmatmul.bf16.gmra.mxu3 %v5282_v50  ;;  %v5783_v6 = vld [vmem:[#allocation14_spill] sm:$0xff] }
 0x36f   : > { %v2583_v26 = vpop.f32.mrf.mxu2  ;;  %v2247_v15 = vpop.f32.mrf.mxu0 }
 0x370   : > { %v2752_v27 = vpop.f32.mrf.mxu3  ;;  %v2416_v41 = vpop.f32.mrf.mxu1 }
 0x371   : > { %v2753_v18 = vadd.f32 %v2752_v27, %v2583_v26  ;;  %v2417_v59 = vadd.f32 %v2416_v41, %v2247_v15 }
 0x373   : > { %v3674_v43 = vpack.c.bf16 %v2753_v18, %v2415_v9  ;;  %v5784_v9 = vld [vmem:[#allocation15_spill] sm:$0xff] }
 0x375   : > { %3802 = vst [vmem:[%s5149_s19 + $0x148] sm:$0xff] %v3674_v43 }
 0x377   : > { %v2585_v47 = vpop.f32.mrf.mxu2  ;;  %v2250_v45 = vpop.f32.mrf.mxu0 }
 0x378   : > { %v2754_v8 = vpop.f32.mrf.mxu3  ;;  %v2419_v62 = vpop.f32.mrf.mxu1 }
 0x379   : > { %v2755_v3 = vadd.f32 %v2754_v8, %v2585_v47  ;;  %v2420_v50 = vadd.f32 %v2419_v62, %v2250_v45 }
 0x37a   : > { %2289 = vmatmul.bf16.gmra.mxu0 %v5294_v56 }
 0x37b   : > { %v3676_v44 = vpack.c.bf16 %v2755_v3, %v2417_v59  ;;  %2458 = vmatmul.bf16.gmra.mxu1 %v5296_v5 }
 0x37c   : > { %2627 = vmatmul.bf16.gmra.mxu2 %v5294_v56 }
 0x37d   : > { %3804 = vst [vmem:[%s5149_s19 + $0x158] sm:$0xff] %v3676_v44  ;;  %2796 = vmatmul.bf16.gmra.mxu3 %v5296_v5 }
 0x37f   : > { %v2588_v0 = vpop.f32.mrf.mxu2  ;;  %v2252_v25 = vpop.f32.mrf.mxu0 }
 0x380   : > { %v2757_v48 = vpop.f32.mrf.mxu3  ;;  %v2421_v2 = vpop.f32.mrf.mxu1 }
 0x381   : > { %v2758_v31 = vadd.f32 %v2757_v48, %v2588_v0  ;;  %v2422_v33 = vadd.f32 %v2421_v2, %v2252_v25  ;;  %v5785_v0 = vld [vmem:[#allocation16_spill] sm:$0xff]  ;;  %v5786_v48 = vld [vmem:[#allocation17_spill] sm:$0xff] }
 0x383   : > { %v3678_v34 = vpack.c.bf16 %v2758_v31, %v2420_v50 }
 0x385   : > { %3806 = vst [vmem:[%s5149_s19 + $0x168] sm:$0xff] %v3678_v34 }
 0x387   : > { %v2590_v60 = vpop.f32.mrf.mxu2  ;;  %v2255_v32 = vpop.f32.mrf.mxu0 }
 0x388   : > { %v2759_v61 = vpop.f32.mrf.mxu3  ;;  %v2424_v49 = vpop.f32.mrf.mxu1 }
 0x389   : > { %v2760_v11 = vadd.f32 %v2759_v61, %v2590_v60  ;;  %v2425_v5 = vadd.f32 %v2424_v49, %v2255_v32 }
 0x38a   : > { %2294 = vmatmul.bf16.gmra.mxu0 %v5308_v40 }
 0x38b   : > { %v3680_v56 = vpack.c.bf16 %v2760_v11, %v2422_v33  ;;  %2463 = vmatmul.bf16.gmra.mxu1 %v5310_v52 }
 0x38c   : > { %2632 = vmatmul.bf16.gmra.mxu2 %v5308_v40 }
 0x38d   : > { %3808 = vst [vmem:[%s5149_s19 + $0x178] sm:$0xff] %v3680_v56  ;;  %2801 = vmatmul.bf16.gmra.mxu3 %v5310_v52  ;;  %v5782_v52 = vld [vmem:[#allocation13_spill] sm:$0xff] }
 0x38f   : > { %v2593_v57 = vpop.f32.mrf.mxu2  ;;  %v2257_v21 = vpop.f32.mrf.mxu0 }
 0x390   : > { %v2762_v20 = vpop.f32.mrf.mxu3  ;;  %v2426_v17 = vpop.f32.mrf.mxu1 }
 0x391   : > { %v2763_v10 = vadd.f32 %v2762_v20, %v2593_v57  ;;  %v2427_v37 = vadd.f32 %v2426_v17, %v2257_v21  ;;  %v5787_v21 = vld [vmem:[#allocation18_spill] sm:$0xff] }
 0x393   : > { %v3682_v16 = vpack.c.bf16 %v2763_v10, %v2425_v5  ;;  %v5788_v10 = vld [vmem:[#allocation19_spill] sm:$0xff] }
 0x395   : > { %3810 = vst [vmem:[%s5149_s19 + $0x188] sm:$0xff] %v3682_v16 }
 0x397   : > { %v2595_v58 = vpop.f32.mrf.mxu2  ;;  %v2260_v19 = vpop.f32.mrf.mxu0 }
 0x398   : > { %v2764_v1 = vpop.f32.mrf.mxu3  ;;  %v2429_v39 = vpop.f32.mrf.mxu1 }
 0x399   : > { %v2765_v23 = vadd.f32 %v2764_v1, %v2595_v58  ;;  %v2430_v28 = vadd.f32 %v2429_v39, %v2260_v19 }
 0x39a   : > { %2299 = vmatmul.bf16.gmra.mxu0 %v5781_v29 }
 0x39b   : > { %v3684_v40 = vpack.c.bf16 %v2765_v23, %v2427_v37  ;;  %2468 = vmatmul.bf16.gmra.mxu1 %v5782_v52 }
 0x39c   : > { %2637 = vmatmul.bf16.gmra.mxu2 %v5781_v29 }
 0x39d   : > { %3812 = vst [vmem:[%s5149_s19 + $0x198] sm:$0xff] %v3684_v40  ;;  %2806 = vmatmul.bf16.gmra.mxu3 %v5782_v52 }
 0x39f   : > { %v2598_v35 = vpop.f32.mrf.mxu2  ;;  %v2262_v55 = vpop.f32.mrf.mxu0 }
 0x3a0   : > { %v2767_v54 = vpop.f32.mrf.mxu3  ;;  %v2431_v51 = vpop.f32.mrf.mxu1 }
 0x3a1   : > { %v2768_v7 = vadd.f32 %v2767_v54, %v2598_v35  ;;  %v2432_v30 = vadd.f32 %v2431_v51, %v2262_v55  ;;  %v5789_v55 = vld [vmem:[#allocation20_spill] sm:$0xff] }
 0x3a3   : > { %v3686_v53 = vpack.c.bf16 %v2768_v7, %v2430_v28  ;;  %v5790_v7 = vld [vmem:[#allocation21_spill] sm:$0xff] }
 0x3a5   : > { %3814 = vst [vmem:[%s5149_s19 + $0x1a8] sm:$0xff] %v3686_v53 }
 0x3a7   : > { %v2600_v13 = vpop.f32.mrf.mxu2  ;;  %v2265_v24 = vpop.f32.mrf.mxu0 }
 0x3a8   : > { %v2769_v63 = vpop.f32.mrf.mxu3  ;;  %v2434_v42 = vpop.f32.mrf.mxu1 }
 0x3a9   : > { %v2770_v14 = vadd.f32 %v2769_v63, %v2600_v13  ;;  %v2435_v26 = vadd.f32 %v2434_v42, %v2265_v24 }
 0x3aa   : > { %2304 = vmatmul.bf16.gmra.mxu0 %v5783_v6 }
 0x3ab   : > { %v3688_v46 = vpack.c.bf16 %v2770_v14, %v2432_v30  ;;  %2473 = vmatmul.bf16.gmra.mxu1 %v5784_v9 }
 0x3ac   : > { %2642 = vmatmul.bf16.gmra.mxu2 %v5783_v6 }
 0x3ad   : > { %3816 = vst [vmem:[%s5149_s19 + $0x1b8] sm:$0xff] %v3688_v46  ;;  %2811 = vmatmul.bf16.gmra.mxu3 %v5784_v9 }
 0x3af   : > { %v2603_v27 = vpop.f32.mrf.mxu2  ;;  %v2267_v18 = vpop.f32.mrf.mxu0 }
 0x3b0   : > { %v2772_v15 = vpop.f32.mrf.mxu3  ;;  %v2436_v43 = vpop.f32.mrf.mxu1 }
 0x3b1   : > { %v2773_v41 = vadd.f32 %v2772_v15, %v2603_v27  ;;  %v2437_v3 = vadd.f32 %v2436_v43, %v2267_v18  ;;  %v5791_v18 = vld [vmem:[#allocation22_spill] sm:$0xff] }
 0x3b3   : > { %v3690_v47 = vpack.c.bf16 %v2773_v41, %v2435_v26  ;;  %v5792_v41 = vld [vmem:[#allocation23_spill] sm:$0xff] }
 0x3b5   : > { %3818 = vst [vmem:[%s5149_s19 + $0x1c8] sm:$0xff] %v3690_v47 }
 0x3b7   : > { %v2605_v8 = vpop.f32.mrf.mxu2  ;;  %v2270_v59 = vpop.f32.mrf.mxu0 }
 0x3b8   : > { %v2774_v45 = vpop.f32.mrf.mxu3  ;;  %v2439_v44 = vpop.f32.mrf.mxu1 }
 0x3b9   : > { %v2775_v62 = vadd.f32 %v2774_v45, %v2605_v8  ;;  %v2440_v25 = vadd.f32 %v2439_v44, %v2270_v59 }
 0x3ba   : > { %2309 = vmatmul.bf16.gmra.mxu0 %v5785_v0 }
 0x3bb   : > { %v3692_v50 = vpack.c.bf16 %v2775_v62, %v2437_v3  ;;  %2478 = vmatmul.bf16.gmra.mxu1 %v5786_v48 }
 0x3bc   : > { %2647 = vmatmul.bf16.gmra.mxu2 %v5785_v0 }
 0x3bd   : > { %3820 = vst [vmem:[%s5149_s19 + $0x1d8] sm:$0xff] %v3692_v50  ;;  %2816 = vmatmul.bf16.gmra.mxu3 %v5786_v48 }
 0x3bf   : > { %v2608_v31 = vpop.f32.mrf.mxu2  ;;  %v2272_v34 = vpop.f32.mrf.mxu0 }
 0x3c0   : > { %v2777_v2 = vpop.f32.mrf.mxu3  ;;  %v2441_v61 = vpop.f32.mrf.mxu1 }
 0x3c1   : > { %v2778_v60 = vadd.f32 %v2777_v2, %v2608_v31  ;;  %v2442_v56 = vadd.f32 %v2441_v61, %v2272_v34 }
 0x3c3   : > { %v3694_v32 = vpack.c.bf16 %v2778_v60, %v2440_v25 }
 0x3c5   : > { %3822 = vst [vmem:[%s5149_s19 + $0x1e8] sm:$0xff] %v3694_v32 }
 0x3c7   : > { %v2610_v33 = vpop.f32.mrf.mxu2  ;;  %v2275_v49 = vpop.f32.mrf.mxu0 }
 0x3c8   : > { %v2779_v11 = vpop.f32.mrf.mxu3  ;;  %v2444_v57 = vpop.f32.mrf.mxu1 }
 0x3c9   : > { %v2780_v5 = vadd.f32 %v2779_v11, %v2610_v33  ;;  %v2445_v17 = vadd.f32 %v2444_v57, %v2275_v49 }
 0x3ca   : > { %2314 = vmatmul.bf16.gmra.mxu0 %v5787_v21 }
 0x3cb   : > { %v3696_v20 = vpack.c.bf16 %v2780_v5, %v2442_v56  ;;  %2483 = vmatmul.bf16.gmra.mxu1 %v5788_v10 }
 0x3cc   : > { %2652 = vmatmul.bf16.gmra.mxu2 %v5787_v21 }
 0x3cd   : > { %3824 = vst [vmem:[%s5149_s19 + $0x1f8] sm:$0xff] %v3696_v20  ;;  %2821 = vmatmul.bf16.gmra.mxu3 %v5788_v10 }
 0x3cf   : > { %v2613_v16 = vpop.f32.mrf.mxu2  ;;  %v2277_v1 = vpop.f32.mrf.mxu0 }
 0x3d0   : > { %v2782_v58 = vpop.f32.mrf.mxu3  ;;  %v2446_v37 = vpop.f32.mrf.mxu1 }
 0x3d1   : > { %v2783_v19 = vadd.f32 %v2782_v58, %v2613_v16  ;;  %v2447_v52 = vadd.f32 %v2446_v37, %v2277_v1 }
 0x3d3   : > { %v3698_v23 = vpack.c.bf16 %v2783_v19, %v2445_v17 }
 0x3d5   : > { %3826 = vst [vmem:[%s5149_s19 + $0x208] sm:$0xff] %v3698_v23 }
 0x3d7   : > { %v2615_v39 = vpop.f32.mrf.mxu2  ;;  %v2280_v29 = vpop.f32.mrf.mxu0 }
 0x3d8   : > { %v2784_v40 = vpop.f32.mrf.mxu3  ;;  %v2449_v35 = vpop.f32.mrf.mxu1 }
 0x3d9   : > { %v2785_v28 = vadd.f32 %v2784_v40, %v2615_v39  ;;  %v2450_v51 = vadd.f32 %v2449_v35, %v2280_v29 }
 0x3da   : > { %2319 = vmatmul.bf16.gmra.mxu0 %v5789_v55 }
 0x3db   : > { %v3700_v54 = vpack.c.bf16 %v2785_v28, %v2447_v52  ;;  %2488 = vmatmul.bf16.gmra.mxu1 %v5790_v7 }
 0x3dc   : > { %2657 = vmatmul.bf16.gmra.mxu2 %v5789_v55  ;;  %v5795_v55 = vld [vmem:[#allocation26_spill] sm:$0xff] }
 0x3dd   : > { %3828 = vst [vmem:[%s5149_s19 + $0x218] sm:$0xff] %v3700_v54  ;;  %2826 = vmatmul.bf16.gmra.mxu3 %v5790_v7  ;;  %v5794_v54 = vld [vmem:[#allocation25_spill] sm:$0xff] }
 0x3df   : > { %v2618_v53 = vpop.f32.mrf.mxu2  ;;  %v2282_v63 = vpop.f32.mrf.mxu0 }
 0x3e0   : > { %v2787_v13 = vpop.f32.mrf.mxu3  ;;  %v2451_v30 = vpop.f32.mrf.mxu1 }
 0x3e1   : > { %v2788_v24 = vadd.f32 %v2787_v13, %v2618_v53  ;;  %v2452_v9 = vadd.f32 %v2451_v30, %v2282_v63 }
 0x3e3   : > { %v3702_v14 = vpack.c.bf16 %v2788_v24, %v2450_v51 }
 0x3e5   : > { %3830 = vst [vmem:[%s5149_s19 + $0x228] sm:$0xff] %v3702_v14 }
 0x3e7   : > { %v2620_v42 = vpop.f32.mrf.mxu2  ;;  %v2285_v6 = vpop.f32.mrf.mxu0 }
 0x3e8   : > { %v2789_v46 = vpop.f32.mrf.mxu3  ;;  %v2454_v27 = vpop.f32.mrf.mxu1 }
 0x3e9   : > { %v2790_v26 = vadd.f32 %v2789_v46, %v2620_v42  ;;  %v2455_v43 = vadd.f32 %v2454_v27, %v2285_v6 }
 0x3ea   : > { %2324 = vmatmul.bf16.gmra.mxu0 %v5791_v18 }
 0x3eb   : > { %v3704_v15 = vpack.c.bf16 %v2790_v26, %v2452_v9  ;;  %2493 = vmatmul.bf16.gmra.mxu1 %v5792_v41 }
 0x3ec   : > { %2662 = vmatmul.bf16.gmra.mxu2 %v5791_v18  ;;  %v5797_v18 = vld [vmem:[#allocation28_spill] sm:$0xff] }
 0x3ed   : > { %3832 = vst [vmem:[%s5149_s19 + $0x238] sm:$0xff] %v3704_v15  ;;  %2831 = vmatmul.bf16.gmra.mxu3 %v5792_v41  ;;  %v5796_v15 = vld [vmem:[#allocation27_spill] sm:$0xff] }
 0x3ef   : > { %v2623_v47 = vpop.f32.mrf.mxu2  ;;  %v2287_v45 = vpop.f32.mrf.mxu0 }
 0x3f0   : > { %v2792_v8 = vpop.f32.mrf.mxu3  ;;  %v2456_v3 = vpop.f32.mrf.mxu1 }
 0x3f1   : > { %v2793_v59 = vadd.f32 %v2792_v8, %v2623_v47  ;;  %v2457_v48 = vadd.f32 %v2456_v3, %v2287_v45 }
 0x3f3   : > { %v3706_v62 = vpack.c.bf16 %v2793_v59, %v2455_v43 }
 0x3f5   : > { %3834 = vst [vmem:[%s5149_s19 + $0x248] sm:$0xff] %v3706_v62 }
 0x3f7   : > { %v2625_v44 = vpop.f32.mrf.mxu2  ;;  %v2290_v0 = vpop.f32.mrf.mxu0 }
 0x3f8   : > { %v2794_v50 = vpop.f32.mrf.mxu3  ;;  %v2459_v31 = vpop.f32.mrf.mxu1 }
 0x3f9   : > { %v2795_v25 = vadd.f32 %v2794_v50, %v2625_v44  ;;  %v2460_v34 = vadd.f32 %v2459_v31, %v2290_v0 }
 0x3fa   : > { %2329 = vmatmul.bf16.gmra.mxu0 %v5406_v36 }
 0x3fb   : > { %v3708_v2 = vpack.c.bf16 %v2795_v25, %v2457_v48  ;;  %2498 = vmatmul.bf16.gmra.mxu1 %v5408_v38 }
 0x3fc   : > { %2667 = vmatmul.bf16.gmra.mxu2 %v5406_v36 }
 0x3fd   : > { %3836 = vst [vmem:[%s5149_s19 + $0x258] sm:$0xff] %v3708_v2  ;;  %2836 = vmatmul.bf16.gmra.mxu3 %v5408_v38  ;;  %v5793_v38 = vld [vmem:[#allocation24_spill] sm:$0xff] }
 0x3ff   : > { %v2628_v60 = vpop.f32.mrf.mxu2  ;;  %v2292_v32 = vpop.f32.mrf.mxu0 }
 0x400   : > { %v2797_v61 = vpop.f32.mrf.mxu3  ;;  %v2461_v11 = vpop.f32.mrf.mxu1 }
 0x401   : > { %v2798_v33 = vadd.f32 %v2797_v61, %v2628_v60  ;;  %v2462_v20 = vadd.f32 %v2461_v11, %v2292_v32 }
 0x403   : > { %v3710_v49 = vpack.c.bf16 %v2798_v33, %v2460_v34 }
 0x405   : > { %3838 = vst [vmem:[%s5149_s19 + $0x268] sm:$0xff] %v3710_v49 }
 0x407   : > { %v2630_v56 = vpop.f32.mrf.mxu2  ;;  %v2295_v57 = vpop.f32.mrf.mxu0 }
 0x408   : > { %v2799_v5 = vpop.f32.mrf.mxu3  ;;  %v2464_v10 = vpop.f32.mrf.mxu1 }
 0x409   : > { %v2800_v21 = vadd.f32 %v2799_v5, %v2630_v56  ;;  %v2465_v17 = vadd.f32 %v2464_v10, %v2295_v57 }
 0x40a   : > { %2334 = vmatmul.bf16.gmra.mxu0 %v5420_v22 }
 0x40b   : > { %v3712_v36 = vpack.c.bf16 %v2800_v21, %v2462_v20  ;;  %2503 = vmatmul.bf16.gmra.mxu1 %v5793_v38 }
 0x40c   : > { %2672 = vmatmul.bf16.gmra.mxu2 %v5420_v22 }
 0x40d   : > { %3840 = vst [vmem:[%s5149_s19 + $0x278] sm:$0xff] %v3712_v36  ;;  %2841 = vmatmul.bf16.gmra.mxu3 %v5793_v38 }
 0x40f   : > { %v2633_v16 = vpop.f32.mrf.mxu2  ;;  %v2297_v1 = vpop.f32.mrf.mxu0 }
 0x410   : > { %v2802_v58 = vpop.f32.mrf.mxu3  ;;  %v2466_v37 = vpop.f32.mrf.mxu1 }
 0x411   : > { %v2803_v19 = vadd.f32 %v2802_v58, %v2633_v16  ;;  %v2467_v52 = vadd.f32 %v2466_v37, %v2297_v1 }
 0x413   : > { %v3714_v23 = vpack.c.bf16 %v2803_v19, %v2465_v17 }
 0x415   : > { %3842 = vst [vmem:[%s5149_s19 + $0x288] sm:$0xff] %v3714_v23 }
 0x417   : > { %v2635_v39 = vpop.f32.mrf.mxu2  ;;  %v2300_v29 = vpop.f32.mrf.mxu0 }
 0x418   : > { %v2804_v40 = vpop.f32.mrf.mxu3  ;;  %v2469_v35 = vpop.f32.mrf.mxu1 }
 0x419   : > { %v2805_v28 = vadd.f32 %v2804_v40, %v2635_v39  ;;  %v2470_v7 = vadd.f32 %v2469_v35, %v2300_v29 }
 0x41a   : > { %2339 = vmatmul.bf16.gmra.mxu0 %v5794_v54 }
 0x41b   : > { %v3716_v22 = vpack.c.bf16 %v2805_v28, %v2467_v52  ;;  %2508 = vmatmul.bf16.gmra.mxu1 %v5795_v55 }
 0x41c   : > { %2677 = vmatmul.bf16.gmra.mxu2 %v5794_v54 }
 0x41d   : > { %3844 = vst [vmem:[%s5149_s19 + $0x298] sm:$0xff] %v3716_v22  ;;  %2846 = vmatmul.bf16.gmra.mxu3 %v5795_v55 }
 0x41f   : > { %v2638_v51 = vpop.f32.mrf.mxu2  ;;  %v2302_v13 = vpop.f32.mrf.mxu0 }
 0x420   : > { %v2807_v53 = vpop.f32.mrf.mxu3  ;;  %v2471_v24 = vpop.f32.mrf.mxu1 }
 0x421   : > { %v2808_v63 = vadd.f32 %v2807_v53, %v2638_v51  ;;  %v2472_v6 = vadd.f32 %v2471_v24, %v2302_v13 }
 0x423   : > { %v3718_v30 = vpack.c.bf16 %v2808_v63, %v2470_v7 }
 0x425   : > { %3846 = vst [vmem:[%s5149_s19 + $0x2a8] sm:$0xff] %v3718_v30 }
 0x427   : > { %v2640_v14 = vpop.f32.mrf.mxu2  ;;  %v2305_v46 = vpop.f32.mrf.mxu0 }
 0x428   : > { %v2809_v42 = vpop.f32.mrf.mxu3  ;;  %v2474_v26 = vpop.f32.mrf.mxu1 }
 0x429   : > { %v2810_v9 = vadd.f32 %v2809_v42, %v2640_v14  ;;  %v2475_v41 = vadd.f32 %v2474_v26, %v2305_v46 }
 0x42a   : > { %2344 = vmatmul.bf16.gmra.mxu0 %v5796_v15 }
 0x42b   : > { %v3720_v27 = vpack.c.bf16 %v2810_v9, %v2472_v6  ;;  %2513 = vmatmul.bf16.gmra.mxu1 %v5797_v18 }
 0x42c   : > { %2682 = vmatmul.bf16.gmra.mxu2 %v5796_v15 }
 0x42d   : > { %3848 = vst [vmem:[%s5149_s19 + $0x2b8] sm:$0xff] %v3720_v27  ;;  %2851 = vmatmul.bf16.gmra.mxu3 %v5797_v18 }
 0x42f   : > { %v2643_v43 = vpop.f32.mrf.mxu2  ;;  %v2307_v8 = vpop.f32.mrf.mxu0 }
 0x430   : > { %v2812_v47 = vpop.f32.mrf.mxu3  ;;  %v2476_v59 = vpop.f32.mrf.mxu1 }
 0x431   : > { %v2813_v45 = vadd.f32 %v2812_v47, %v2643_v43  ;;  %v2477_v0 = vadd.f32 %v2476_v59, %v2307_v8 }
 0x433   : > { %v3722_v3 = vpack.c.bf16 %v2813_v45, %v2475_v41 }
 0x435   : > { %3850 = vst [vmem:[%s5149_s19 + $0x2c8] sm:$0xff] %v3722_v3 }
 0x437   : > { %v2645_v62 = vpop.f32.mrf.mxu2  ;;  %v2310_v50 = vpop.f32.mrf.mxu0 }
 0x438   : > { %v2814_v44 = vpop.f32.mrf.mxu3  ;;  %v2479_v25 = vpop.f32.mrf.mxu1 }
 0x439   : > { %v2815_v48 = vadd.f32 %v2814_v44, %v2645_v62  ;;  %v2480_v2 = vadd.f32 %v2479_v25, %v2310_v50 }
 0x43a   : > { %2349 = vmatmul.bf16.gmra.mxu0 %v5462_v12 }
 0x43b   : > { %v3724_v31 = vpack.c.bf16 %v2815_v48, %v2477_v0  ;;  %2518 = vmatmul.bf16.gmra.mxu1 %v5464_v4 }
 0x43c   : > { %2687 = vmatmul.bf16.gmra.mxu2 %v5462_v12 }
 0x43d   : > { %3852 = vst [vmem:[%s5149_s19 + $0x2d8] sm:$0xff] %v3724_v31  ;;  %2856 = vmatmul.bf16.gmra.mxu3 %v5464_v4 }
 0x43f   : > { %v2648_v34 = vpop.f32.mrf.mxu2  ;;  %v2312_v61 = vpop.f32.mrf.mxu0 }
 0x440   : > { %v2817_v60 = vpop.f32.mrf.mxu3  ;;  %v2481_v33 = vpop.f32.mrf.mxu1 }
 0x441   : > { %v2818_v32 = vadd.f32 %v2817_v60, %v2648_v34  ;;  %v2482_v57 = vadd.f32 %v2481_v33, %v2312_v61 }
 0x443   : > { %v3726_v11 = vpack.c.bf16 %v2818_v32, %v2480_v2 }
 0x445   : > { %3854 = vst [vmem:[%s5149_s19 + $0x2e8] sm:$0xff] %v3726_v11 }
 0x447   : > { %v2650_v49 = vpop.f32.mrf.mxu2  ;;  %v2315_v5 = vpop.f32.mrf.mxu0 }
 0x448   : > { %v2819_v56 = vpop.f32.mrf.mxu3  ;;  %v2484_v21 = vpop.f32.mrf.mxu1 }
 0x449   : > { %v2820_v20 = vadd.f32 %v2819_v56, %v2650_v49  ;;  %v2485_v4 = vadd.f32 %v2484_v21, %v2315_v5 }
 0x44b   : > { %v3728_v12 = vpack.c.bf16 %v2820_v20, %v2482_v57 }
 0x44d   : > { %3856 = vst [vmem:[%s5149_s19 + $0x2f8] sm:$0xff] %v3728_v12 }
 0x44f   : > { %v2653_v10 = vpop.f32.mrf.mxu2  ;;  %v2317_v38 = vpop.f32.mrf.mxu0 }
 0x450   : > { %v2822_v36 = vpop.f32.mrf.mxu3  ;;  %v2486_v16 = vpop.f32.mrf.mxu1 }
 0x451   : > { %v2823_v17 = vadd.f32 %v2822_v36, %v2653_v10  ;;  %v2487_v23 = vadd.f32 %v2486_v16, %v2317_v38 }
 0x453   : > { %v3730_v58 = vpack.c.bf16 %v2823_v17, %v2485_v4 }
 0x455   : > { %3858 = vst [vmem:[%s5149_s19 + $0x308] sm:$0xff] %v3730_v58 }
 0x457   : > { %v2655_v1 = vpop.f32.mrf.mxu2  ;;  %v2320_v37 = vpop.f32.mrf.mxu0 }
 0x458   : > { %v2824_v19 = vpop.f32.mrf.mxu3  ;;  %v2489_v40 = vpop.f32.mrf.mxu1 }
 0x459   : > { %v2825_v39 = vadd.f32 %v2824_v19, %v2655_v1  ;;  %v2490_v52 = vadd.f32 %v2489_v40, %v2320_v37 }
 0x45b   : > { %v3732_v29 = vpack.c.bf16 %v2825_v39, %v2487_v23 }
 0x45d   : > { %3860 = vst [vmem:[%s5149_s19 + $0x318] sm:$0xff] %v3732_v29 }
 0x45f   : > { %v2658_v28 = vpop.f32.mrf.mxu2  ;;  %v2322_v22 = vpop.f32.mrf.mxu0 }
 0x460   : > { %v2827_v35 = vpop.f32.mrf.mxu3  ;;  %v2491_v55 = vpop.f32.mrf.mxu1 }
 0x461   : > { %v2828_v54 = vadd.f32 %v2827_v35, %v2658_v28  ;;  %v2492_v63 = vadd.f32 %v2491_v55, %v2322_v22 }
 0x463   : > { %v3734_v7 = vpack.c.bf16 %v2828_v54, %v2490_v52 }
 0x465   : > { %3862 = vst [vmem:[%s5149_s19 + $0x328] sm:$0xff] %v3734_v7 }
 0x467   : > { %v2660_v51 = vpop.f32.mrf.mxu2  ;;  %v2325_v13 = vpop.f32.mrf.mxu0 }
 0x468   : > { %v2829_v53 = vpop.f32.mrf.mxu3  ;;  %v2494_v30 = vpop.f32.mrf.mxu1 }
 0x469   : > { %v2830_v24 = vadd.f32 %v2829_v53, %v2660_v51  ;;  %v2495_v42 = vadd.f32 %v2494_v30, %v2325_v13 }
 0x46b   : > { %v3736_v14 = vpack.c.bf16 %v2830_v24, %v2492_v63 }
 0x46d   : > { %3864 = vst [vmem:[%s5149_s19 + $0x338] sm:$0xff] %v3736_v14 }
 0x46f   : > { %v2663_v46 = vpop.f32.mrf.mxu2  ;;  %v2327_v9 = vpop.f32.mrf.mxu0 }
 0x470   : > { %v2832_v6 = vpop.f32.mrf.mxu3  ;;  %v2496_v27 = vpop.f32.mrf.mxu1 }
 0x471   : > { %v2833_v26 = vadd.f32 %v2832_v6, %v2663_v46  ;;  %v2497_v47 = vadd.f32 %v2496_v27, %v2327_v9 }
 0x473   : > { %v3738_v15 = vpack.c.bf16 %v2833_v26, %v2495_v42 }
 0x475   : > { %3866 = vst [vmem:[%s5149_s19 + $0x348] sm:$0xff] %v3738_v15 }
 0x477   : > { %v2665_v18 = vpop.f32.mrf.mxu2  ;;  %v2330_v43 = vpop.f32.mrf.mxu0 }
 0x478   : > { %v2834_v41 = vpop.f32.mrf.mxu3  ;;  %v2499_v45 = vpop.f32.mrf.mxu1 }
 0x479   : > { %v2835_v8 = vadd.f32 %v2834_v41, %v2665_v18  ;;  %v2500_v3 = vadd.f32 %v2499_v45, %v2330_v43 }
 0x47b   : > { %v3740_v59 = vpack.c.bf16 %v2835_v8, %v2497_v47 }
 0x47d   : > { %3868 = vst [vmem:[%s5149_s19 + $0x358] sm:$0xff] %v3740_v59 }
 0x47f   : > { %v2668_v62 = vpop.f32.mrf.mxu2  ;;  %v2332_v50 = vpop.f32.mrf.mxu0 }
 0x480   : > { %v2837_v44 = vpop.f32.mrf.mxu3  ;;  %v2501_v48 = vpop.f32.mrf.mxu1 }
 0x481   : > { %v2838_v0 = vadd.f32 %v2837_v44, %v2668_v62  ;;  %v2502_v60 = vadd.f32 %v2501_v48, %v2332_v50 }
 0x483   : > { %v3742_v25 = vpack.c.bf16 %v2838_v0, %v2500_v3 }
 0x485   : > { %3870 = vst [vmem:[%s5149_s19 + $0x368] sm:$0xff] %v3742_v25 }
 0x487   : > { %v2670_v31 = vpop.f32.mrf.mxu2  ;;  %v2335_v34 = vpop.f32.mrf.mxu0 }
 0x488   : > { %v2839_v2 = vpop.f32.mrf.mxu3  ;;  %v2504_v32 = vpop.f32.mrf.mxu1 }
 0x489   : > { %v2840_v61 = vadd.f32 %v2839_v2, %v2670_v31  ;;  %v2505_v11 = vadd.f32 %v2504_v32, %v2335_v34 }
 0x48b   : > { %v3744_v33 = vpack.c.bf16 %v2840_v61, %v2502_v60 }
 0x48d   : > { %3872 = vst [vmem:[%s5149_s19 + $0x378] sm:$0xff] %v3744_v33 }
 0x48f   : > { %v2673_v49 = vpop.f32.mrf.mxu2  ;;  %v2337_v5 = vpop.f32.mrf.mxu0 }
 0x490   : > { %v2842_v56 = vpop.f32.mrf.mxu3  ;;  %v2506_v20 = vpop.f32.mrf.mxu1 }
 0x491   : > { %v2843_v57 = vadd.f32 %v2842_v56, %v2673_v49  ;;  %v2507_v36 = vadd.f32 %v2506_v20, %v2337_v5 }
 0x493   : > { %v3746_v21 = vpack.c.bf16 %v2843_v57, %v2505_v11 }
 0x495   : > { %3874 = vst [vmem:[%s5149_s19 + $0x388] sm:$0xff] %v3746_v21 }
 0x497   : > { %v2675_v12 = vpop.f32.mrf.mxu2  ;;  %v2340_v10 = vpop.f32.mrf.mxu0 }
 0x498   : > { %v2844_v4 = vpop.f32.mrf.mxu3  ;;  %v2509_v17 = vpop.f32.mrf.mxu1 }
 0x499   : > { %v2845_v38 = vadd.f32 %v2844_v4, %v2675_v12  ;;  %v2510_v58 = vadd.f32 %v2509_v17, %v2340_v10 }
 0x49b   : > { %v3748_v16 = vpack.c.bf16 %v2845_v38, %v2507_v36 }
 0x49d   : > { %3876 = vst [vmem:[%s5149_s19 + $0x398] sm:$0xff] %v3748_v16 }
 0x49f   : > { %v2678_v1 = vpop.f32.mrf.mxu2  ;;  %v2342_v37 = vpop.f32.mrf.mxu0 }
 0x4a0   : > { %v2847_v19 = vpop.f32.mrf.mxu3  ;;  %v2511_v39 = vpop.f32.mrf.mxu1 }
 0x4a1   : > { %v2848_v23 = vadd.f32 %v2847_v19, %v2678_v1  ;;  %v2512_v35 = vadd.f32 %v2511_v39, %v2342_v37 }
 0x4a3   : > { %v3750_v40 = vpack.c.bf16 %v2848_v23, %v2510_v58 }
 0x4a5   : > { %3878 = vst [vmem:[%s5149_s19 + $0x3a8] sm:$0xff] %v3750_v40 }
 0x4a7   : > { %v2680_v29 = vpop.f32.mrf.mxu2  ;;  %v2345_v28 = vpop.f32.mrf.mxu0 }
 0x4a8   : > { %v2849_v52 = vpop.f32.mrf.mxu3  ;;  %v2514_v54 = vpop.f32.mrf.mxu1 }
 0x4a9   : > { %v2850_v22 = vadd.f32 %v2849_v52, %v2680_v29  ;;  %v2515_v7 = vadd.f32 %v2514_v54, %v2345_v28 }
 0x4ab   : > { %v3752_v55 = vpack.c.bf16 %v2850_v22, %v2512_v35 }
 0x4ad   : > { %3880 = vst [vmem:[%s5149_s19 + $0x3b8] sm:$0xff] %v3752_v55 }
 0x4af   : > { %v2683_v51 = vpop.f32.mrf.mxu2  ;;  %v2347_v63 = vpop.f32.mrf.mxu0 }
 0x4b0   : > { %v2852_v53 = vpop.f32.mrf.mxu3  ;;  %v2516_v24 = vpop.f32.mrf.mxu1 }
 0x4b1   : > { %v2853_v13 = vadd.f32 %v2852_v53, %v2683_v51  ;;  %v2517_v46 = vadd.f32 %v2516_v24, %v2347_v63 }
 0x4b3   : > { %v3754_v30 = vpack.c.bf16 %v2853_v13, %v2515_v7 }
 0x4b5   : > { %3882 = vst [vmem:[%s5149_s19 + $0x3c8] sm:$0xff] %v3754_v30 }
 0x4b7   : > { %v2685_v14 = vpop.f32.mrf.mxu2  ;;  %v2350_v26 = vpop.f32.mrf.mxu0 }
 0x4b8   : > { %v2854_v42 = vpop.f32.mrf.mxu3  ;;  %v2519_v27 = vpop.f32.mrf.mxu1 }
 0x4b9   : > { %v2855_v6 = vadd.f32 %v2854_v42, %v2685_v14  ;;  %v2520_v15 = vadd.f32 %v2519_v27, %v2350_v26 }
 0x4bb   : > { %v3756_v9 = vpack.c.bf16 %v2855_v6, %v2517_v46 }
 0x4bd   : > { %3884 = vst [vmem:[%s5149_s19 + $0x3d8] sm:$0xff] %v3756_v9 }
 0x4bf   : > { %v2688_v18 = vpop.f32.mrf.mxu2  ;;  %v2352_v8 = vpop.f32.mrf.mxu0 }
 0x4c0   : > { %v2857_v41 = vpop.f32.mrf.mxu3  ;;  %v2521_v45 = vpop.f32.mrf.mxu1 }
 0x4c1   : > { %v2858_v43 = vadd.f32 %v2857_v41, %v2688_v18  ;;  %v2522_v62 = vadd.f32 %v2521_v45, %v2352_v8 }
 0x4c3   : > { %v3758_v47 = vpack.c.bf16 %v2858_v43, %v2520_v15 }
 0x4c5   : > { %3886 = vst [vmem:[%s5149_s19 + $0x3e8] sm:$0xff] %v3758_v47 }
 0x4c7   : > { %v2690_v59 = vpop.f32.mrf.mxu2 }
 0x4c8   : > { %v2859_v3 = vpop.f32.mrf.mxu3 }
 0x4c9   : > { %v2860_v44 = vadd.f32 %v2859_v3, %v2690_v59 }
 0x4cb   : > { %v3760_v50 = vpack.c.bf16 %v2860_v44, %v2522_v62 }
 0x4cd   : > { %3888 = vst [vmem:[%s5149_s19 + $0x3f8] sm:$0xff] %v3760_v50 }
 0x4ce   : > { %4842 = shalt.err (!%p4839_p0)
}
 0x4cf   : > { %s4908_s30 = smov 256   ;;  %s4909_s7 = smov 16  }
 0x4d0   : > { %4682 = dma.vmem_to_hbm [thread:$0]  (%p5004_p5), %s3906_s21, 16384, %s3908_s22, %s3890_s12, %s4908_s30, %s4908_s30, %s4909_s7  }
 0x4d1 PF: > { %s3922_s15 = sand.u32 1, %s4881_s9   ;;  %p4693_p3 = pnand %p4017_p11, %p4974_p6 }
 0x4d2   : > { %s3923_s17 = scalar_lea.sflag [#allocation5], %s3922_s15 }
 0x4d3   : > { %p4694_p7 = pneg %p4693_p3 }
 0x4d5   : > { %4876 = dma.done.wait (%p4694_p7), %s3923_s17, 16384  }
 0x4d6   : > { %4878 = vsyncadd (%p4694_p7), %s3923_s17, 4294950912  ;;  %s19_s14 = sadd.s32 1, %s4901_s14   ;;  %s5798_s9 = smov %s4885_s10 }
 0x4d7   : > { %p16_p9 = scmp.ge.s32.totalorder %s19_s14, 4   ;;  %s5799_s10 = smov %s4889_s11 }
 0x4d8   : > { %s5800_s11 = smov %s5013_s8  ;;  %s5801_s12 = smov %s4897_s13 }
 0x4d9   : > { %s5802_s13 = smov %s5804_s29  ;;  %18 = sbr.rel (!%p16_p9) target bundleno = 7 (0x7), region = 86 }
 0x4de   :  { %3929 = vsyncpa [#allocation4], 1 }
 0x4df   :  { %3931 = vsyncpa [#allocation4 + $0x1], 1 }
 0x4e0   :  { %3932 = vsyncpa [#allocation7], 1 }
 0x4e1   :  { %3933 = vsyncpa [#allocation5], 1 }
 0x4e2   :  { %3935 = vsyncpa [#allocation5 + $0x1], 1 }

</bundles_post_ra>
